<compile_context>
chip_gen: v6e
topology: v6e:2x2x1
jax: 0.10.0
libtpu: 0.0.40
codegen_flags: <defaults>
</compile_context>

<pallas_src>
import functools

import jax
import jax.numpy as jnp
from jax import lax
from jax.experimental import pallas as pl
from jax.experimental.pallas import tpu as pltpu

BN_EPS = 1e-5
LEAKY_SLOPE = 0.2
LANES = 128
TM_MAX = 1024                      # conv-pass rows per grid step
TM2_MAX = 8192                     # elementwise-pass rows per grid step
BLOCK_BYTES = 4 * 1024 * 1024      # per-buffer cap (double-buffered -> 8 MiB)
VMEM_LIMIT = 32 * 1024 * 1024      # explicit scoped-VMEM budget (v7x-safe)


def _round_up(x, m):
    return ((x + m - 1) // m) * m


def _cdiv(a, b):
    return (a + b - 1) // b


def _pick_rows(m, bytes_per_row, max_rows):
    """Tile rows: big enough to amortize ~0.35 us per-step overhead, small
    enough for VMEM double-buffering, and (when possible) >= 2 grid steps so
    both v7x TensorCores get work under dimension_semantics=('parallel',)."""
    rows = min(max_rows, max(8, BLOCK_BYTES // max(bytes_per_row, 1)))
    rows = max(8, (rows // 8) * 8)
    rows = min(rows, max(8, _round_up(_cdiv(m, 2), 8)))
    return rows


def _conv_stats_kernel(patches_ref, w_ref, conv_ref, stats_ref, *, m_total):
    """Pass 1: conv tile on the MXU, narrow f32 conv store, per-tile BN partial
    statistics (row-masked sum and tile-mean-shifted sum of squares)."""
    tm = patches_ref.shape[0]
    c_out = conv_ref.shape[1]
    i = pl.program_id(0)

    acc = jnp.dot(patches_ref[...], w_ref[...],
                  preferred_element_type=jnp.float32)          # (tm, C_pad) f32
    conv_ref[...] = acc[:, :c_out]                             # only real cols

    # Mask rows of the (possibly ragged) last tile; Pallas already masks the
    # conv_ref edge store, but the statistics must exclude garbage rows.
    row = lax.broadcasted_iota(jnp.int32, (tm, 1), 0) + i * tm
    valid = row < m_total
    n = jnp.maximum(jnp.minimum(tm, m_total - i * tm), 1).astype(jnp.float32)

    masked = jnp.where(valid, acc, 0.0)
    s = jnp.sum(masked, axis=0, keepdims=True)                 # (1, C_pad)
    mu = s / n                                                 # tile mean
    d = jnp.where(valid, acc - mu, 0.0)
    m2 = jnp.sum(d * d, axis=0, keepdims=True)                 # (1, C_pad)

    stats_ref[0:1, :] = s
    stats_ref[1:2, :] = m2


def _bn_lrelu_kernel(conv_ref, scale_ref, shift_ref, out_ref):
    """Pass 2: per-channel FMA (fused BN affine) + LeakyReLU(0.2), in place."""
    y = conv_ref[...] * scale_ref[...] + shift_ref[...]
    out_ref[...] = jnp.maximum(y, LEAKY_SLOPE * y)


@functools.partial(jax.jit, static_argnames=("kernel_size", "padding", "dilation"))
def dilated_conv_block(x, weight, gamma, beta, *, kernel_size, padding, dilation):
    """x: (N, C_in, T, H, W), weight: (C_out, C_in, k, 4, 4).  Returns NCTHW."""
    N, C_in, T, H, W = x.shape
    C_out = weight.shape[0]
    k, kh_sz, kw_sz = kernel_size, 4, 4

    # --- im2col: one fused XLA op, channel-last features, bf16.  Left-only time
    # padding == symmetric pad + Chomp3d(padding) (causal conv).  Feature order
    # of K is (C_in, kt, kh, kw) == PyTorch weight.reshape(C_out, -1) flattening.
    patches = lax.conv_general_dilated_patches(
        x.astype(jnp.bfloat16),
        filter_shape=(k, kh_sz, kw_sz),
        window_strides=(1, 2, 2),
        padding=[(padding, 0), (1, 1), (1, 1)],
        rhs_dilation=(dilation, 1, 1),
        dimension_numbers=("NCDHW", "OIDHW", "NDHWC"),
    )                                              # (N, T_out, H_out, W_out, K)
    _, T_out, H_out, W_out, K = patches.shape
    M = N * T_out * H_out * W_out
    patches = patches.reshape(M, K)                # no jnp.pad copy

    # Weight (C_out, C_in, kt, kh, kw) -> (K, C_pad) bf16; lane-dense MXU
    # stationary operand (padding the weight is free; the outputs are not padded).
    C_pad = _round_up(C_out, LANES)
    w_mat = weight.reshape(C_out, K).T.astype(jnp.bfloat16)
    if C_pad != C_out:
        w_mat = jnp.pad(w_mat, ((0, 0), (0, C_pad - C_out)))

    TM = _pick_rows(M, K * 2, TM_MAX)
    G = _cdiv(M, TM)

    conv_cost = pl.CostEstimate(
        flops=2 * M * K * C_pad, transcendentals=0,
        bytes_accessed=M * K * 2 + K * C_pad * 2 + M * C_out * 4 + G * 2 * C_pad * 4)

    # ---------------- pass 1: conv + per-tile partial BN statistics ----------
    conv, stats = pl.pallas_call(
        functools.partial(_conv_stats_kernel, m_total=M),
        out_shape=(jax.ShapeDtypeStruct((M, C_out), jnp.float32),
                   jax.ShapeDtypeStruct((G, 2, C_pad), jnp.float32)),
        grid=(G,),
        in_specs=[
            pl.BlockSpec((TM, K), lambda i: (i, 0)),
            pl.BlockSpec((K, C_pad), lambda i: (0, 0)),
        ],
        out_specs=(
            pl.BlockSpec((TM, C_out), lambda i: (i, 0)),
            pl.BlockSpec((None, 2, C_pad), lambda i: (i, 0, 0)),
        ),
        compiler_params=pltpu.CompilerParams(
            dimension_semantics=("parallel",),
            vmem_limit_bytes=VMEM_LIMIT),
        cost_estimate=conv_cost,
    )(patches, w_mat)

    # --- tiny XLA combine: Chan's parallel variance over per-tile (n, sum, M2).
    n_i = jnp.minimum(TM, M - jnp.arange(G) * TM).astype(jnp.float32)   # (G,)
    sums = stats[:, 0, :C_out]                                          # (G, C)
    m2s = stats[:, 1, :C_out]
    mean = jnp.sum(sums, axis=0) / M
    mu_i = sums / n_i[:, None]
    m2_tot = jnp.sum(m2s, axis=0) + jnp.sum(n_i[:, None] * (mu_i - mean) ** 2, axis=0)
    var = m2_tot / M                                  # biased variance (training)
    inv_std = lax.rsqrt(var + BN_EPS)
    g32 = gamma.astype(jnp.float32)
    scale = (g32 * inv_std).reshape(1, C_out)
    shift = (beta.astype(jnp.float32) - mean * g32 * inv_std).reshape(1, C_out)

    # ---------------- pass 2: fused BN affine + LeakyReLU (in place) ---------
    TM2 = _pick_rows(M, C_out * 4, TM2_MAX)
    G2 = _cdiv(M, TM2)
    bn_cost = pl.CostEstimate(flops=3 * M * C_out, transcendentals=0,
                              bytes_accessed=2 * M * C_out * 4 + 2 * C_out * 4)

    out_flat = pl.pallas_call(
        _bn_lrelu_kernel,
        out_shape=jax.ShapeDtypeStruct((M, C_out), jnp.float32),
        grid=(G2,),
        in_specs=[
            pl.BlockSpec((TM2, C_out), lambda i: (i, 0)),
            pl.BlockSpec((1, C_out), lambda i: (0, 0)),
            pl.BlockSpec((1, C_out), lambda i: (0, 0)),
        ],
        out_specs=pl.BlockSpec((TM2, C_out), lambda i: (i, 0)),
        compiler_params=pltpu.CompilerParams(
            dimension_semantics=("parallel",),
            vmem_limit_bytes=VMEM_LIMIT),
        cost_estimate=bn_cost,
        input_output_aliases={0: 0},
    )(conv, scale, shift)

    # (M, C_out) real-sized (un-padded) -> NCTHW.  This epilogue now touches
    # 16x less data than the previous padded-f32 layout.
    out = out_flat.reshape(N, T_out, H_out, W_out, C_out)
    return out.transpose(0, 4, 1, 2, 3)


def _reference(x, weight, gamma, beta, *, kernel_size, padding, dilation):
    """Pure-JAX reference mirroring the PyTorch module (training-mode BN)."""
    conv = lax.conv_general_dilated(
        x.astype(jnp.float32), weight.astype(jnp.float32),
        window_strides=(1, 2, 2),
        padding=[(padding, padding), (1, 1), (1, 1)],
        rhs_dilation=(dilation, 1, 1),
        dimension_numbers=("NCDHW", "OIDHW", "NCDHW"),
        precision=lax.Precision.HIGHEST)
    if padding > 0:
        conv = conv[:, :, :-padding, :, :]           # Chomp3d
    mean = jnp.mean(conv, axis=(0, 2, 3, 4), keepdims=True)
    var = jnp.mean((conv - mean) ** 2, axis=(0, 2, 3, 4), keepdims=True)
    y = (conv - mean) * lax.rsqrt(var + BN_EPS)
    y = y * gamma.reshape(1, -1, 1, 1, 1) + beta.reshape(1, -1, 1, 1, 1)
    return jnp.where(y >= 0, y, LEAKY_SLOPE * y)


if __name__ == "__main__":
    # Small shapes consistent with DilatedConvBlock(4, 8, kernel_size=2,
    # padding=(kernel_size-1)*dilation, dilation=1, use_noise=False).
    N, C_in, C_out = 2, 4, 8
    T, H, W = 8, 16, 16
    kernel_size, dilation = 2, 1
    padding = (kernel_size - 1) * dilation

    key = jax.random.PRNGKey(0)
    kx, kw, kg, kb = jax.random.split(key, 4)
    x = jax.random.normal(kx, (N, C_in, T, H, W), dtype=jnp.float32)
    weight = jax.random.normal(kw, (C_out, C_in, kernel_size, 4, 4),
                               dtype=jnp.float32) * 0.1
    gamma = 1.0 + 0.1 * jax.random.normal(kg, (C_out,), dtype=jnp.float32)
    beta = 0.1 * jax.random.normal(kb, (C_out,), dtype=jnp.float32)

    # The Pallas path feeds the conv in bf16 (f32 accumulation); pre-round the
    # operands so the f32 reference sees identical inputs (fair comparison).
    x_bf = x.astype(jnp.bfloat16).astype(jnp.float32)
    w_bf = weight.astype(jnp.bfloat16).astype(jnp.float32)

    out = dilated_conv_block(x_bf, w_bf, gamma, beta,
                             kernel_size=kernel_size, padding=padding,
                             dilation=dilation)
    out = jax.block_until_ready(out)

    ref = _reference(x_bf, w_bf, gamma, beta,
                     kernel_size=kernel_size, padding=padding,
                     dilation=dilation)
    assert out.shape == ref.shape
    assert jnp.max(jnp.abs(out - ref)) < 2e-3

    print("KERNEL_OK")
</pallas_src>

<mosaic_0001>
module attributes {stable_mosaic.version = 11 : i64} {
  func.func @_conv_stats_kernel(%arg0: i32, %arg1: memref<512x128xbf16, #tpu.memory_space<vmem>>, %arg2: memref<128x128xbf16, #tpu.memory_space<vmem>>, %arg3: memref<512x8xf32, #tpu.memory_space<vmem>>, %arg4: memref<1x2x128xf32, #tpu.memory_space<vmem>>) attributes {dimension_semantics = [#tpu.dimension_semantics<parallel>], iteration_bounds = array<i64: 2>, scalar_prefetch = 0 : i64, scratch_operands = 0 : i64, tpu.core_type = #tpu.core_type<tc>, window_params = [{transform_indices = @transform_0, window_bounds = array<i64: 512, 128>}, {pipeline_mode = #tpu.pipeline_mode<synchronous>, transform_indices = @transform_1, window_bounds = array<i64: 128, 128>}, {transform_indices = @transform_2, window_bounds = array<i64: 512, 8>}, {transform_indices = @transform_3, window_bounds = array<i64: 1, 2, 128>}]} {
    %c0 = arith.constant 0 : index
    %c0_0 = arith.constant 0 : index
    %0 = vector.load %arg1[%c0, %c0_0] : memref<512x128xbf16, #tpu.memory_space<vmem>>, vector<512x128xbf16>
    %c0_1 = arith.constant 0 : index
    %c0_2 = arith.constant 0 : index
    %1 = vector.load %arg2[%c0_1, %c0_2] : memref<128x128xbf16, #tpu.memory_space<vmem>>, vector<128x128xbf16>
    %cst = arith.constant dense<0.000000e+00> : vector<512x128xf32>
    %2 = tpu.matmul %0, %1, %cst {dimension_numbers = #tpu.dot_dimension_numbers<[1], [0], [0], [1], [0, 0, 1, 1], [], []>} : vector<512x128xbf16>, vector<128x128xbf16>, vector<512x128xf32> -> vector<512x128xf32>
    %3 = vector.extract_strided_slice %2 {offsets = [0, 0], sizes = [512, 8], strides = [1, 1]} : vector<512x128xf32> to vector<512x8xf32>
    %c0_3 = arith.constant 0 : index
    %c0_4 = arith.constant 0 : index
    %4 = vector.load %arg3[%c0_3, %c0_4] : memref<512x8xf32, #tpu.memory_space<vmem>>, vector<512x8xf32>
    tpu.vector_store %arg3[%c0_3, %c0_4], %3 {strides = array<i32>} : memref<512x8xf32, #tpu.memory_space<vmem>>, vector<512x8xf32>,
    %5 = tpu.iota {dimensions = array<i32: 0>} : vector<512x1xi32>
    %c512_i32 = arith.constant 512 : i32
    %6 = arith.muli %arg0, %c512_i32 : i32
    %7 = vector.broadcast %6 : i32 to vector<512x1xi32>
    %8 = arith.addi %5, %7 : vector<512x1xi32>
    %c1024_i32 = arith.constant 1024 : i32
    %9 = vector.broadcast %c1024_i32 : i32 to vector<512x1xi32>
    %10 = arith.cmpi slt, %8, %9 : vector<512x1xi32>
    %c512_i32_5 = arith.constant 512 : i32
    %11 = arith.muli %arg0, %c512_i32_5 : i32
    %c1024_i32_6 = arith.constant 1024 : i32
    %12 = arith.subi %c1024_i32_6, %11 : i32
    %c512_i32_7 = arith.constant 512 : i32
    %13 = arith.minsi %c512_i32_7, %12 : i32
    %c1_i32 = arith.constant 1 : i32
    %14 = arith.maxsi %13, %c1_i32 : i32
    %15 = arith.sitofp %14 : i32 to f32
    %cst_8 = arith.constant 0.000000e+00 : f32
    %16 = vector.shape_cast %10 : vector<512x1xi1> to vector<512x1xi1>
    %17 = vector.broadcast %16 : vector<512x1xi1> to vector<512x128xi1>
    %18 = vector.broadcast %cst_8 : f32 to vector<512x128xf32>
    %19 = arith.select %17, %2, %18 : vector<512x128xi1>, vector<512x128xf32>
    %cst_9 = arith.constant dense<0.000000e+00> : vector<128xf32>
    %20 = vector.multi_reduction <add>, %19, %cst_9 [0] : vector<512x128xf32> to vector<128xf32>
    %21 = vector.shape_cast %20 : vector<128xf32> to vector<1x128xf32>
    %22 = vector.broadcast %15 : f32 to vector<1x128xf32>
    %23 = arith.divf %21, %22 : vector<1x128xf32>
    %24 = vector.broadcast %23 : vector<1x128xf32> to vector<512x128xf32>
    %25 = arith.subf %2, %24 : vector<512x128xf32>
    %cst_10 = arith.constant 0.000000e+00 : f32
    %26 = vector.shape_cast %10 : vector<512x1xi1> to vector<512x1xi1>
    %27 = vector.broadcast %26 : vector<512x1xi1> to vector<512x128xi1>
    %28 = vector.broadcast %cst_10 : f32 to vector<512x128xf32>
    %29 = arith.select %27, %25, %28 : vector<512x128xi1>, vector<512x128xf32>
    %30 = arith.mulf %29, %29 : vector<512x128xf32>
    %cst_11 = arith.constant dense<0.000000e+00> : vector<128xf32>
    %31 = vector.multi_reduction <add>, %30, %cst_11 [0] : vector<512x128xf32> to vector<128xf32>
    %32 = vector.shape_cast %31 : vector<128xf32> to vector<1x128xf32>
    %c0_12 = arith.constant 0 : index
    %c0_13 = arith.constant 0 : index
    %c0_14 = arith.constant 0 : index
    %33 = vector.load %arg4[%c0_12, %c0_13, %c0_14] : memref<1x2x128xf32, #tpu.memory_space<vmem>>, vector<1x1x128xf32>
    %34 = vector.shape_cast %33 : vector<1x1x128xf32> to vector<1x128xf32>
    %35 = vector.shape_cast %21 : vector<1x128xf32> to vector<1x1x128xf32>
    tpu.vector_store %arg4[%c0_12, %c0_13, %c0_14], %35 {strides = array<i32>} : memref<1x2x128xf32, #tpu.memory_space<vmem>>, vector<1x1x128xf32>,
    %c0_15 = arith.constant 0 : index
    %c1 = arith.constant 1 : index
    %c0_16 = arith.constant 0 : index
    %36 = vector.load %arg4[%c0_15, %c1, %c0_16] : memref<1x2x128xf32, #tpu.memory_space<vmem>>, vector<1x1x128xf32>
    %37 = vector.shape_cast %36 : vector<1x1x128xf32> to vector<1x128xf32>
    %38 = vector.shape_cast %32 : vector<1x128xf32> to vector<1x1x128xf32>
    tpu.vector_store %arg4[%c0_15, %c1, %c0_16], %38 {strides = array<i32>} : memref<1x2x128xf32, #tpu.memory_space<vmem>>, vector<1x1x128xf32>,
    return
  }
  func.func @transform_0(%arg0: i32) -> (i32, i32) {
    %c0_i32 = arith.constant 0 : i32
    %c0_i32_0 = arith.constant 0 : i32
    return %arg0, %c0_i32 : i32, i32
  }
  func.func @transform_1(%arg0: i32) -> (i32, i32) {
    %c0_i32 = arith.constant 0 : i32
    %c0_i32_0 = arith.constant 0 : i32
    %c0_i32_1 = arith.constant 0 : i32
    return %c0_i32, %c0_i32_0 : i32, i32
  }
  func.func @transform_2(%arg0: i32) -> (i32, i32) {
    %c0_i32 = arith.constant 0 : i32
    %c0_i32_0 = arith.constant 0 : i32
    return %arg0, %c0_i32 : i32, i32
  }
  func.func @transform_3(%arg0: i32) -> (i32, i32, i32) {
    %c0_i32 = arith.constant 0 : i32
    %c0_i32_0 = arith.constant 0 : i32
    %c0_i32_1 = arith.constant 0 : i32
    return %arg0, %c0_i32, %c0_i32_0 : i32, i32, i32
  }
}

module attributes {stable_mosaic.version = 11 : i64} {
  func.func @_bn_lrelu_kernel(%arg0: i32, %arg1: memref<512x8xf32, #tpu.memory_space<vmem>>, %arg2: memref<1x8xf32, #tpu.memory_space<vmem>>, %arg3: memref<1x8xf32, #tpu.memory_space<vmem>>, %arg4: memref<512x8xf32, #tpu.memory_space<vmem>>) attributes {dimension_semantics = [#tpu.dimension_semantics<parallel>], iteration_bounds = array<i64: 2>, scalar_prefetch = 0 : i64, scratch_operands = 0 : i64, tpu.core_type = #tpu.core_type<tc>, window_params = [{transform_indices = @transform_0, window_bounds = array<i64: 512, 8>}, {pipeline_mode = #tpu.pipeline_mode<synchronous>, transform_indices = @transform_1, window_bounds = array<i64: 1, 8>}, {pipeline_mode = #tpu.pipeline_mode<synchronous>, transform_indices = @transform_2, window_bounds = array<i64: 1, 8>}, {transform_indices = @transform_3, window_bounds = array<i64: 512, 8>}]} {
    %c0 = arith.constant 0 : index
    %c0_0 = arith.constant 0 : index
    %0 = vector.load %arg1[%c0, %c0_0] : memref<512x8xf32, #tpu.memory_space<vmem>>, vector<512x8xf32>
    %c0_1 = arith.constant 0 : index
    %c0_2 = arith.constant 0 : index
    %1 = vector.load %arg2[%c0_1, %c0_2] : memref<1x8xf32, #tpu.memory_space<vmem>>, vector<1x8xf32>
    %2 = vector.broadcast %1 : vector<1x8xf32> to vector<512x8xf32>
    %3 = arith.mulf %0, %2 : vector<512x8xf32>
    %c0_3 = arith.constant 0 : index
    %c0_4 = arith.constant 0 : index
    %4 = vector.load %arg3[%c0_3, %c0_4] : memref<1x8xf32, #tpu.memory_space<vmem>>, vector<1x8xf32>
    %5 = vector.broadcast %4 : vector<1x8xf32> to vector<512x8xf32>
    %6 = arith.addf %3, %5 : vector<512x8xf32>
    %cst = arith.constant 2.000000e-01 : f32
    %7 = vector.broadcast %cst : f32 to vector<512x8xf32>
    %8 = arith.mulf %7, %6 : vector<512x8xf32>
    %9 = arith.maximumf %6, %8 : vector<512x8xf32>
    %c0_5 = arith.constant 0 : index
    %c0_6 = arith.constant 0 : index
    %10 = vector.load %arg4[%c0_5, %c0_6] : memref<512x8xf32, #tpu.memory_space<vmem>>, vector<512x8xf32>
    tpu.vector_store %arg4[%c0_5, %c0_6], %9 {strides = array<i32>} : memref<512x8xf32, #tpu.memory_space<vmem>>, vector<512x8xf32>,
    return
  }
  func.func @transform_0(%arg0: i32) -> (i32, i32) {
    %c0_i32 = arith.constant 0 : i32
    %c0_i32_0 = arith.constant 0 : i32
    return %arg0, %c0_i32 : i32, i32
  }
  func.func @transform_1(%arg0: i32) -> (i32, i32) {
    %c0_i32 = arith.constant 0 : i32
    %c0_i32_0 = arith.constant 0 : i32
    %c0_i32_1 = arith.constant 0 : i32
    return %c0_i32, %c0_i32_0 : i32, i32
  }
  func.func @transform_2(%arg0: i32) -> (i32, i32) {
    %c0_i32 = arith.constant 0 : i32
    %c0_i32_0 = arith.constant 0 : i32
    %c0_i32_1 = arith.constant 0 : i32
    return %c0_i32, %c0_i32_0 : i32, i32
  }
  func.func @transform_3(%arg0: i32) -> (i32, i32) {
    %c0_i32 = arith.constant 0 : i32
    %c0_i32_0 = arith.constant 0 : i32
    return %arg0, %c0_i32 : i32, i32
  }
}

</mosaic_0001>

<bundles_post_ra>
// kernel: dilated_conv_block.3
= control target key start
LH: loop header
LB: loop body
LE: loop exit
PB: predicated region body
PF: predicated region fallthrough
CT: control target
= control target key end

     0   :  { %s678_s12 = smov 0   ;;  %s1311_s0 = inlined_call_operand.vmem [shape: f32[1024,8], index: 0, kind: input, shape index: {}, may-alias: {0,3}]   ;;  %s1312_s1 = inlined_call_operand.vmem [shape: f32[1,8], index: 1, kind: input, shape index: {}]   ;;  %s1313_s2 = inlined_call_operand.vmem [shape: f32[1,8], index: 2, kind: input, shape index: {}]   ;;  %s1314_s3 = inlined_call_operand.vmem [shape: f32[1024,8], index: 3, kind: output, shape index: {}, may-alias: {0,3}]  }
   0x1 LB: > { %s629_s13 = sadd.s32 4294967295, %s656_s12   ;;  %p633_p0 = scmp.ge.s32.totalorder %s656_s12, 1  ;;  %s656_s12 = sphi %s678_s12, %s13_s12  }
   0x2   : > { %p138_p1 = scmp.lt.s32.totalorder %s656_s12, 3 }
   0x4   : > { %p139_p2 = pnand %p633_p0, %p138_p1 }
   0x6   : > { %142 = sbr.rel (%p139_p2) target bundleno = 95 (0x5f), region = 32 }
   0xb   : > { %s634_s14 = sshll.u32 %s629_s13, 6  ;;  %v692_v0 = vld [vmem:[%s1312_s1] ss:$0 sm:$0xff]  ;;  %vm508_vm0 = vcmask 64512  }
   0xc   : > { %p163_p3 = scmp.lt.s32.totalorder %s634_s14, 127  ;;  %v704_v1 = vld [vmem:[%s1313_s2] ss:$0 sm:$0xff] }
   0xe   : > { %s1372_s14 = smov (!%p163_p3, %s634_s14), 127 }
   0xf   : > { %s635_s15 = sshll.u32 %s1372_s14, 3 }
  0x10   : > { %s699_s20 = scalar_lea.vmem %s1311_s0, %s635_s15  ;;  %s886_s25 = scalar_lea.vmem %s1314_s3, %s635_s15 }
  0x11   : > { %v174_v2 = vld [vmem:[%s699_s20] sm:$0xff]  ;;  %v175_v3 = vld [vmem:[%s699_s20 + $0x8] sm:$0xff]  ;;  %v176_v4 = vld [vmem:[%s699_s20 + $0x10] sm:$0xff] }
  0x12   : > { %v177_v5 = vld [vmem:[%s699_s20 + $0x18] sm:$0xff]  ;;  %v178_v6 = vld [vmem:[%s699_s20 + $0x20] sm:$0xff]  ;;  %v179_v7 = vld [vmem:[%s699_s20 + $0x28] sm:$0xff]  ;;  %v245_v8 = vmul.f32 %v692_v0, %v174_v2  ;;  %v246_v9 = vmul.f32 %v692_v0, %v175_v3  ;;  %v247_v10 = vmul.f32 %v692_v0, %v176_v4 }
  0x13   : > { %v180_v11 = vld [vmem:[%s699_s20 + $0x30] sm:$0xff]  ;;  %v181_v12 = vld [vmem:[%s699_s20 + $0x38] sm:$0xff]  ;;  %v182_v13 = vld [vmem:[%s699_s20 + $0x40] sm:$0xff]  ;;  %v248_v14 = vmul.f32 %v692_v0, %v177_v5  ;;  %v249_v15 = vmul.f32 %v692_v0, %v178_v6  ;;  %v250_v16 = vmul.f32 %v692_v0, %v179_v7 }
  0x14   : > { %v183_v17 = vld [vmem:[%s699_s20 + $0x48] sm:$0xff]  ;;  %v184_v18 = vld [vmem:[%s699_s20 + $0x50] sm:$0xff]  ;;  %v185_v19 = vld [vmem:[%s699_s20 + $0x58] sm:$0xff]  ;;  %v725_v20 = vadd.f32 %v704_v1, %v245_v8  ;;  %v728_v21 = vadd.f32 %v704_v1, %v246_v9  ;;  %v731_v22 = vadd.f32 %v704_v1, %v247_v10  ;;  %v251_v23 = vmul.f32 %v692_v0, %v180_v11 }
  0x15   : > { %v735_v24 = vadd.f32 %v704_v1, %v248_v14  ;;  %v738_v25 = vadd.f32 %v704_v1, %v249_v15  ;;  %v741_v26 = vadd.f32 %v704_v1, %v250_v16  ;;  %v252_v27 = vmul.f32 %v692_v0, %v181_v12  ;;  %v186_v32 = vld [vmem:[%s699_s20 + $0x60] sm:$0xff]  ;;  %v187_v33 = vld [vmem:[%s699_s20 + $0x68] sm:$0xff]  ;;  %v188_v38 = vld [vmem:[%s699_s20 + $0x70] sm:$0xff] }
  0x16   : > { %v745_v28 = vmul.f32 0.2, %v725_v20  ;;  %v748_v29 = vadd.f32 %v704_v1, %v251_v23  ;;  %v253_v30 = vmul.f32 %v692_v0, %v182_v13  ;;  %v254_v31 = vmul.f32 %v692_v0, %v183_v17  ;;  %v189_v39 = vld [vmem:[%s699_s20 + $0x78] sm:$0xff]  ;;  %v190_v52 = vld [vmem:[%s699_s20 + $0x80] sm:$0xff]  ;;  %v191_v53 = vld [vmem:[%s699_s20 + $0x88] sm:$0xff] }
  0x17   : > { %v755_v34 = vmul.f32 0.2, %v728_v21  ;;  %v758_v35 = vadd.f32 %v704_v1, %v252_v27  ;;  %v255_v36 = vmul.f32 %v692_v0, %v184_v18  ;;  %v256_v37 = vmul.f32 %v692_v0, %v185_v19  ;;  %v192_v58 = vld [vmem:[%s699_s20 + $0x90] sm:$0xff]  ;;  %v193_v59 = vld [vmem:[%s699_s20 + $0x98] sm:$0xff]  ;;  %v194_v10 = vld [vmem:[%s699_s20 + $0xa0] sm:$0xff] }
  0x18   : > { %v767_v41 = vmul.f32 0.2, %v731_v22  ;;  %v770_v42 = vadd.f32 %v704_v1, %v253_v30  ;;  %v773_v43 = vadd.f32 %v704_v1, %v254_v31  ;;  %v778_v45 = vmul.f32 0.2, %v735_v24  ;;  %v195_v11 = vld [vmem:[%s699_s20 + $0xa8] sm:$0xff]  ;;  %v196_v16 = vld [vmem:[%s699_s20 + $0xb0] sm:$0xff] }
  0x19   : > { %v781_v46 = vadd.f32 %v704_v1, %v255_v36  ;;  %v784_v47 = vadd.f32 %v704_v1, %v256_v37  ;;  %v789_v49 = vmul.f32 0.2, %v738_v25  ;;  %v257_v50 = vmul.f32 %v692_v0, %v186_v32  ;;  %v197_v17 = vld [vmem:[%s699_s20 + $0xb8] sm:$0xff]  ;;  %v925_v36 = vld [vmem:[%s699_s20 + $0x128] sm:$0xff]  ;;  %v928_v30 = vld [vmem:[%s699_s20 + $0x130] sm:$0xff] }
  0x1a   : > { %v258_v51 = vmul.f32 %v692_v0, %v187_v33  ;;  %v798_v55 = vmul.f32 0.2, %v741_v26  ;;  %v259_v56 = vmul.f32 %v692_v0, %v188_v38  ;;  %v260_v57 = vmul.f32 %v692_v0, %v189_v39  ;;  %v931_v18 = vld [vmem:[%s699_s20 + $0x138] sm:$0xff]  ;;  %v934_v12 = vld [vmem:[%s699_s20 + $0x140] sm:$0xff]  ;;  %v937_v6 = vld [vmem:[%s699_s20 + $0x148] sm:$0xff] }
  0x1b   : > { %v807_v61 = vmul.f32 0.2, %v748_v29  ;;  %v810_v62 = vadd.f32 %v704_v1, %v257_v50  ;;  %v818_v3 = vmul.f32 0.2, %v758_v35  ;;  %v829_v7 = vmul.f32 0.2, %v770_v42 }
  0x1c   : > { %v813_v63 = vadd.f32 %v704_v1, %v258_v51  ;;  %v821_v4 = vadd.f32 %v704_v1, %v259_v56  ;;  %v824_v5 = vadd.f32 %v704_v1, %v260_v57  ;;  %v261_v8 = vmul.f32 %v692_v0, %v190_v52  ;;  %v198_v50 = vld [vmem:[%s699_s20 + $0xc0] sm:$0xff]  ;;  %v889_v57 = vld [vmem:[%s699_s20 + $0xc8] sm:$0xff]  ;;  %1315 = vst [vmem:[#allocation2_spill] sm:$0xff] %v931_v18  ;;  %v940_v2 = vld [vmem:[%s699_s20 + $0x150] sm:$0xff] }
  0x1d   : > { %v262_v9 = vmul.f32 %v692_v0, %v191_v53  ;;  %v838_v13 = vmul.f32 0.2, %v773_v43  ;;  %v263_v14 = vmul.f32 %v692_v0, %v192_v58  ;;  %v264_v15 = vmul.f32 %v692_v0, %v193_v59  ;;  %v892_v58 = vld [vmem:[%s699_s20 + $0xd0] sm:$0xff]  ;;  %v895_v59 = vld [vmem:[%s699_s20 + $0xd8] sm:$0xff]  ;;  %v922_v51 = vld [vmem:[%s699_s20 + $0x120] sm:$0xff]  ;;  %1316 = vst [vmem:[#allocation3_spill] sm:$0xff] %v934_v12 }
  0x1e   : > { %v847_v19 = vmul.f32 0.2, %v781_v46  ;;  %v850_v23 = vadd.f32 %v704_v1, %v261_v8  ;;  %v858_v31 = vmul.f32 0.2, %v784_v47  ;;  %v869_v37 = vmul.f32 0.2, %v810_v62 }
  0x1f   : > { %v853_v27 = vadd.f32 %v704_v1, %v262_v9  ;;  %v861_v32 = vadd.f32 %v704_v1, %v263_v14  ;;  %v864_v33 = vadd.f32 %v704_v1, %v264_v15  ;;  %v265_v38 = vmul.f32 %v692_v0, %v194_v10  ;;  %v898_v8 = vld [vmem:[%s699_s20 + $0xe0] sm:$0xff]  ;;  %v901_v9 = vld [vmem:[%s699_s20 + $0xe8] sm:$0xff]  ;;  %v904_v10 = vld [vmem:[%s699_s20 + $0xf0] sm:$0xff]  ;;  %1317 = vst [vmem:[#allocation4_spill] sm:$0xff] %v937_v6 }
  0x20   : > { %v266_v39 = vmul.f32 %v692_v0, %v195_v11  ;;  %v877_v52 = vmul.f32 0.2, %v813_v63  ;;  %v267_v53 = vmul.f32 %v692_v0, %v196_v16  ;;  %v268_v56 = vmul.f32 %v692_v0, %v197_v17  ;;  %v907_v11 = vld [vmem:[%s699_s20 + $0xf8] sm:$0xff]  ;;  %v910_v14 = vld [vmem:[%s699_s20 + $0x100] sm:$0xff]  ;;  %v913_v15 = vld [vmem:[%s699_s20 + $0x108] sm:$0xff]  ;;  %1318 = vst [vmem:[#allocation5_spill] sm:$0xff] %v940_v2 }
  0x21   : > { %v916_v16 = vld [vmem:[%s699_s20 + $0x110] sm:$0xff]  ;;  %v919_v17 = vld [vmem:[%s699_s20 + $0x118] sm:$0xff]  ;;  %v946_v54 = vld [vmem:[%s699_s20 + $0x160] sm:$0xff] }
  0x22   : > { %v943_v60 = vld [vmem:[%s699_s20 + $0x158] sm:$0xff]  ;;  %1320 = vst [vmem:[#allocation7_spill] sm:$0xff] %v946_v54  ;;  %v949_v48 = vld [vmem:[%s699_s20 + $0x168] sm:$0xff]  ;;  %v952_v44 = vld [vmem:[%s699_s20 + $0x170] sm:$0xff] }
  0x23   : > { %1319 = vst [vmem:[#allocation6_spill] sm:$0xff] %v943_v60  ;;  %1321 = vst [vmem:[#allocation8_spill] sm:$0xff] %v949_v48  ;;  %v955_v40 = vld [vmem:[%s699_s20 + $0x178] sm:$0xff]  ;;  %v958_v18 = vld [vmem:[%s699_s20 + $0x180] sm:$0xff] }
  0x24   : > { %1322 = vst [vmem:[#allocation9_spill] sm:$0xff] %v952_v44  ;;  %1323 = vst [vmem:[#allocation10_spill] sm:$0xff] %v955_v40  ;;  %v961_v12 = vld [vmem:[%s699_s20 + $0x188] sm:$0xff]  ;;  %v964_v6 = vld [vmem:[%s699_s20 + $0x190] sm:$0xff] }
  0x25   : > { %1324 = vst [vmem:[#allocation11_spill] sm:$0xff] %v958_v18  ;;  %1325 = vst [vmem:[#allocation12_spill] sm:$0xff] %v961_v12  ;;  %v967_v2 = vld [vmem:[%s699_s20 + $0x198] sm:$0xff]  ;;  %v970_v60 = vld [vmem:[%s699_s20 + $0x1a0] sm:$0xff] }
  0x26   : > { %1326 = vst [vmem:[#allocation13_spill] sm:$0xff] %v964_v6  ;;  %1327 = vst [vmem:[#allocation14_spill] sm:$0xff] %v967_v2  ;;  %v973_v54 = vld [vmem:[%s699_s20 + $0x1a8] sm:$0xff]  ;;  %v976_v48 = vld [vmem:[%s699_s20 + $0x1b0] sm:$0xff]  ;;  %v456_v6 = vmax.f32 %v810_v62, %v869_v37  ;;  %v394_v2 = vmul.f32 0.2, %v821_v4  ;;  %v457_v62 = vmax.f32 %v813_v63, %v877_v52 }
  0x27   : > { %1328 = vst [vmem:[#allocation15_spill] sm:$0xff] %v973_v54  ;;  %1329 = vst [vmem:[#allocation16_spill] sm:$0xff] %v976_v48  ;;  %v979_v44 = vld [vmem:[%s699_s20 + $0x1b8] sm:$0xff]  ;;  %v982_v40 = vld [vmem:[%s699_s20 + $0x1c0] sm:$0xff]  ;;  %v336_v54 = vadd.f32 %v704_v1, %v265_v38  ;;  %v337_v48 = vadd.f32 %v704_v1, %v266_v39  ;;  %v395_v37 = vmul.f32 0.2, %v824_v5  ;;  %v338_v38 = vadd.f32 %v704_v1, %v267_v53 }
  0x28   : > { %1330 = vst [vmem:[#allocation17_spill] sm:$0xff] %v979_v44  ;;  %1331 = vst [vmem:[#allocation18_spill] sm:$0xff] %v982_v40  ;;  %v985_v18 = vld [vmem:[%s699_s20 + $0x1c8] sm:$0xff]  ;;  %v988_v12 = vld [vmem:[%s699_s20 + $0x1d0] sm:$0xff]  ;;  %v339_v39 = vadd.f32 %v704_v1, %v268_v56  ;;  %v396_v63 = vmul.f32 0.2, %v850_v23  ;;  %v269_v53 = vmul.f32 %v692_v0, %v198_v50  ;;  %v1337_v56 = vmax.f32 %v725_v20, %v745_v28 }
  0x29   : > { %1332 = vst [vmem:[#allocation19_spill] sm:$0xff] %v985_v18  ;;  %v996_v44 = vld [vmem:[%s699_s20 + $0x1d8] sm:$0xff]  ;;  %v999_v40 = vld [vmem:[%s699_s20 + $0x1e0] sm:$0xff]  ;;  %v1002_v18 = vld [vmem:[%s699_s20 + $0x1e8] sm:$0xff]  ;;  %v397_v52 = vmul.f32 0.2, %v853_v27  ;;  %v1341_v20 = vmax.f32 %v738_v25, %v789_v49  ;;  %v1345_v25 = vmax.f32 %v770_v42, %v829_v7  ;;  %v1347_v28 = vmax.f32 %v781_v46, %v847_v19 }
  0x2a   : > { %1333 = vst [vmem:[#allocation20_spill] sm:$0xff] %v996_v44  ;;  %1334 = vst [vmem:[#allocation21_spill] sm:$0xff] %v999_v40  ;;  %v1010_v44 = vld [vmem:[%s699_s20 + $0x1f0] sm:$0xff]  ;;  %v1013_v40 = vld [vmem:[%s699_s20 + $0x1f8] sm:$0xff]  ;;  %v400_v42 = vmul.f32 0.2, %v336_v54  ;;  %v270_v7 = vmul.f32 %v692_v0, %v889_v57  ;;  %v276_v57 = vmul.f32 %v692_v0, %v907_v11 }
  0x2b   : > { %1335 = vst [vmem:[#allocation22_spill] sm:$0xff] %v1002_v18  ;;  %1336 = vst [vmem:[#allocation23_spill] sm:$0xff] %v1010_v44  ;;  %v458_v18 = vmax.f32 %v821_v4, %v394_v2  ;;  %v1338_v44 = vmax.f32 %v728_v21, %v755_v34  ;;  %v1339_v2 = vmax.f32 %v731_v22, %v767_v41  ;;  %v399_v41 = vmul.f32 0.2, %v864_v33 }
  0x2c   : > { %509 = vst.msk [vmem:[%s886_s25] sm:$0xff] %vm508_vm0, %v1337_v56  ;;  %v1340_v4 = vmax.f32 %v735_v24, %v778_v45  ;;  %513 = vst.msk [vmem:[%s886_s25 + $0x20] sm:$0xff] %vm508_vm0, %v1341_v20  ;;  %v1342_v21 = vmax.f32 %v741_v26, %v798_v55  ;;  %v1343_v22 = vmax.f32 %v748_v29, %v807_v61  ;;  %v401_v45 = vmul.f32 0.2, %v337_v48 }
  0x2d   : > { %510 = vst.msk [vmem:[%s886_s25 + $0x8] sm:$0xff] %vm508_vm0, %v1338_v44  ;;  %511 = vst.msk [vmem:[%s886_s25 + $0x10] sm:$0xff] %vm508_vm0, %v1339_v2  ;;  %v1344_v24 = vmax.f32 %v758_v35, %v818_v3  ;;  %v1346_v26 = vmax.f32 %v773_v43, %v838_v13  ;;  %v1348_v29 = vmax.f32 %v784_v47, %v858_v31  ;;  %v398_v35 = vmul.f32 0.2, %v861_v32 }
  0x2e   : > { %512 = vst.msk [vmem:[%s886_s25 + $0x18] sm:$0xff] %vm508_vm0, %v1340_v4  ;;  %514 = vst.msk [vmem:[%s886_s25 + $0x28] sm:$0xff] %vm508_vm0, %v1342_v21  ;;  %v459_v34 = vmax.f32 %v824_v5, %v395_v37  ;;  %v460_v43 = vmax.f32 %v850_v23, %v396_v63  ;;  %v461_v44 = vmax.f32 %v853_v27, %v397_v52  ;;  %v402_v46 = vmul.f32 0.2, %v338_v38 }
  0x2f   : > { %515 = vst.msk [vmem:[%s886_s25 + $0x30] sm:$0xff] %vm508_vm0, %v1343_v22  ;;  %516 = vst.msk [vmem:[%s886_s25 + $0x38] sm:$0xff] %vm508_vm0, %v1344_v24  ;;  %v462_v47 = vmax.f32 %v861_v32, %v398_v35  ;;  %v463_v49 = vmax.f32 %v864_v33, %v399_v41  ;;  %v464_v55 = vmax.f32 %v336_v54, %v400_v42  ;;  %v403_v61 = vmul.f32 0.2, %v339_v39  ;;  %v1349_v41 = vld [vmem:[#allocation2_spill] sm:$0xff] }
  0x30   : > { %517 = vst.msk [vmem:[%s886_s25 + $0x40] sm:$0xff] %vm508_vm0, %v1345_v25  ;;  %518 = vst.msk [vmem:[%s886_s25 + $0x48] sm:$0xff] %vm508_vm0, %v1346_v26  ;;  %v465_v3 = vmax.f32 %v337_v48, %v401_v45  ;;  %v466_v5 = vmax.f32 %v338_v38, %v402_v46  ;;  %v271_v13 = vmul.f32 %v692_v0, %v892_v58 }
  0x31   : > { %519 = vst.msk [vmem:[%s886_s25 + $0x50] sm:$0xff] %vm508_vm0, %v1347_v28  ;;  %520 = vst.msk [vmem:[%s886_s25 + $0x58] sm:$0xff] %vm508_vm0, %v1348_v29  ;;  %v467_v54 = vmax.f32 %v339_v39, %v403_v61  ;;  %v272_v48 = vmul.f32 %v692_v0, %v895_v59  ;;  %v341_v23 = vadd.f32 %v704_v1, %v270_v7 }
  0x32   : > { %521 = vst.msk [vmem:[%s886_s25 + $0x60] sm:$0xff] %vm508_vm0, %v456_v6  ;;  %522 = vst.msk [vmem:[%s886_s25 + $0x68] sm:$0xff] %vm508_vm0, %v457_v62  ;;  %v340_v6 = vadd.f32 %v704_v1, %v269_v53  ;;  %v274_v27 = vmul.f32 %v692_v0, %v901_v9  ;;  %v275_v31 = vmul.f32 %v692_v0, %v904_v10 }
  0x33   : > { %523 = vst.msk [vmem:[%s886_s25 + $0x70] sm:$0xff] %vm508_vm0, %v458_v18  ;;  %524 = vst.msk [vmem:[%s886_s25 + $0x78] sm:$0xff] %vm508_vm0, %v459_v34  ;;  %v273_v18 = vmul.f32 %v692_v0, %v898_v8  ;;  %v342_v32 = vadd.f32 %v704_v1, %v271_v13  ;;  %v343_v33 = vadd.f32 %v704_v1, %v272_v48  ;;  %v405_v59 = vmul.f32 0.2, %v341_v23 }
  0x34   : > { %525 = vst.msk [vmem:[%s886_s25 + $0x80] sm:$0xff] %vm508_vm0, %v460_v43  ;;  %526 = vst.msk [vmem:[%s886_s25 + $0x88] sm:$0xff] %vm508_vm0, %v461_v44  ;;  %v404_v19 = vmul.f32 0.2, %v340_v6  ;;  %v345_v8 = vadd.f32 %v704_v1, %v274_v27  ;;  %v346_v9 = vadd.f32 %v704_v1, %v275_v31  ;;  %v347_v38 = vadd.f32 %v704_v1, %v276_v57  ;;  %v1351_v27 = vld [vmem:[#allocation4_spill] sm:$0xff]  ;;  %v1353_v57 = vld [vmem:[#allocation6_spill] sm:$0xff] }
  0x35   : > { %527 = vst.msk [vmem:[%s886_s25 + $0x90] sm:$0xff] %vm508_vm0, %v462_v47  ;;  %528 = vst.msk [vmem:[%s886_s25 + $0x98] sm:$0xff] %vm508_vm0, %v463_v49  ;;  %v344_v50 = vadd.f32 %v704_v1, %v273_v18  ;;  %v406_v62 = vmul.f32 0.2, %v342_v32  ;;  %v407_v10 = vmul.f32 0.2, %v343_v33  ;;  %v469_v39 = vmax.f32 %v341_v23, %v405_v59 }
  0x36   : > { %529 = vst.msk [vmem:[%s886_s25 + $0xa0] sm:$0xff] %vm508_vm0, %v464_v55  ;;  %530 = vst.msk [vmem:[%s886_s25 + $0xa8] sm:$0xff] %vm508_vm0, %v465_v3  ;;  %v468_v58 = vmax.f32 %v340_v6, %v404_v19  ;;  %v409_v63 = vmul.f32 0.2, %v345_v8  ;;  %v410_v11 = vmul.f32 0.2, %v346_v9  ;;  %v277_v52 = vmul.f32 %v692_v0, %v910_v14 }
  0x37   : > { %531 = vst.msk [vmem:[%s886_s25 + $0xb0] sm:$0xff] %vm508_vm0, %v466_v5  ;;  %532 = vst.msk [vmem:[%s886_s25 + $0xb8] sm:$0xff] %vm508_vm0, %v467_v54  ;;  %v408_v37 = vmul.f32 0.2, %v344_v50  ;;  %v470_v53 = vmax.f32 %v342_v32, %v406_v62  ;;  %v471_v56 = vmax.f32 %v343_v33, %v407_v10  ;;  %v411_v4 = vmul.f32 0.2, %v347_v38 }
  0x38   : > { %533 = vst.msk [vmem:[%s886_s25 + $0xc0] sm:$0xff] %vm508_vm0, %v468_v58  ;;  %534 = vst.msk [vmem:[%s886_s25 + $0xc8] sm:$0xff] %vm508_vm0, %v469_v39  ;;  %v473_v20 = vmax.f32 %v345_v8, %v409_v63  ;;  %v474_v21 = vmax.f32 %v346_v9, %v410_v11  ;;  %v348_v22 = vadd.f32 %v704_v1, %v277_v52  ;;  %v1350_v5 = vld [vmem:[#allocation3_spill] sm:$0xff]  ;;  %v1352_v33 = vld [vmem:[#allocation5_spill] sm:$0xff] }
  0x39   : > { %v472_v2 = vmax.f32 %v344_v50, %v408_v37  ;;  %v278_v24 = vmul.f32 %v692_v0, %v913_v15  ;;  %535 = vst.msk [vmem:[%s886_s25 + $0xd0] sm:$0xff] %vm508_vm0, %v470_v53  ;;  %536 = vst.msk [vmem:[%s886_s25 + $0xd8] sm:$0xff] %vm508_vm0, %v471_v56  ;;  %v475_v14 = vmax.f32 %v347_v38, %v411_v4  ;;  %v1354_v59 = vld [vmem:[#allocation7_spill] sm:$0xff]  ;;  %v1355_v10 = vld [vmem:[#allocation8_spill] sm:$0xff] }
  0x3a   : > { %v279_v25 = vmul.f32 %v692_v0, %v916_v16  ;;  %v280_v26 = vmul.f32 %v692_v0, %v919_v17  ;;  %v281_v28 = vmul.f32 %v692_v0, %v922_v51  ;;  %538 = vst.msk [vmem:[%s886_s25 + $0xe8] sm:$0xff] %vm508_vm0, %v473_v20  ;;  %539 = vst.msk [vmem:[%s886_s25 + $0xf0] sm:$0xff] %vm508_vm0, %v474_v21  ;;  %v412_v15 = vmul.f32 0.2, %v348_v22  ;;  %v1356_v38 = vld [vmem:[#allocation9_spill] sm:$0xff]  ;;  %v1357_v53 = vld [vmem:[#allocation10_spill] sm:$0xff] }
  0x3b   : > { %537 = vst.msk [vmem:[%s886_s25 + $0xe0] sm:$0xff] %vm508_vm0, %v472_v2  ;;  %v349_v29 = vadd.f32 %v704_v1, %v278_v24  ;;  %v282_v34 = vmul.f32 %v692_v0, %v925_v36  ;;  %v283_v16 = vmul.f32 %v692_v0, %v928_v30  ;;  %540 = vst.msk [vmem:[%s886_s25 + $0xf8] sm:$0xff] %vm508_vm0, %v475_v14 }
  0x3c   : > { %v350_v17 = vadd.f32 %v704_v1, %v279_v25  ;;  %v351_v51 = vadd.f32 %v704_v1, %v280_v26  ;;  %v352_v35 = vadd.f32 %v704_v1, %v281_v28  ;;  %v284_v42 = vmul.f32 %v692_v0, %v1349_v41 }
  0x3d   : > { %v476_v43 = vmax.f32 %v348_v22, %v412_v15  ;;  %v413_v44 = vmul.f32 0.2, %v349_v29  ;;  %v353_v45 = vadd.f32 %v704_v1, %v282_v34  ;;  %v354_v36 = vadd.f32 %v704_v1, %v283_v16 }
  0x3e   : > { %v414_v46 = vmul.f32 0.2, %v350_v17  ;;  %v415_v30 = vmul.f32 0.2, %v351_v51  ;;  %v416_v47 = vmul.f32 0.2, %v352_v35  ;;  %v355_v49 = vadd.f32 %v704_v1, %v284_v42 }
  0x3f   : > { %541 = vst.msk [vmem:[%s886_s25 + $0x100] sm:$0xff] %vm508_vm0, %v476_v43  ;;  %v477_v55 = vmax.f32 %v349_v29, %v413_v44  ;;  %v417_v61 = vmul.f32 0.2, %v353_v45  ;;  %v418_v3 = vmul.f32 0.2, %v354_v36  ;;  %v285_v6 = vmul.f32 %v692_v0, %v1350_v5  ;;  %v1358_v29 = vld [vmem:[#allocation11_spill] sm:$0xff] }
  0x40   : > { %v478_v7 = vmax.f32 %v350_v17, %v414_v46  ;;  %v479_v54 = vmax.f32 %v351_v51, %v415_v30  ;;  %v480_v13 = vmax.f32 %v352_v35, %v416_v47  ;;  %v419_v48 = vmul.f32 0.2, %v355_v49  ;;  %v1359_v44 = vld [vmem:[#allocation12_spill] sm:$0xff]  ;;  %v1360_v46 = vld [vmem:[#allocation13_spill] sm:$0xff]  ;;  %v1361_v47 = vld [vmem:[#allocation14_spill] sm:$0xff] }
  0x41   : > { %542 = vst.msk [vmem:[%s886_s25 + $0x108] sm:$0xff] %vm508_vm0, %v477_v55  ;;  %v481_v18 = vmax.f32 %v353_v45, %v417_v61  ;;  %v482_v19 = vmax.f32 %v354_v36, %v418_v3  ;;  %v356_v23 = vadd.f32 %v704_v1, %v285_v6  ;;  %v286_v31 = vmul.f32 %v692_v0, %v1351_v27  ;;  %v1362_v5 = vld [vmem:[#allocation15_spill] sm:$0xff] }
  0x42   : > { %543 = vst.msk [vmem:[%s886_s25 + $0x110] sm:$0xff] %vm508_vm0, %v478_v7  ;;  %544 = vst.msk [vmem:[%s886_s25 + $0x118] sm:$0xff] %vm508_vm0, %v479_v54  ;;  %v483_v32 = vmax.f32 %v355_v49, %v419_v48  ;;  %v287_v50 = vmul.f32 %v692_v0, %v1352_v33  ;;  %v288_v58 = vmul.f32 %v692_v0, %v1353_v57  ;;  %v1363_v7 = vld [vmem:[#allocation16_spill] sm:$0xff] }
  0x43   : > { %545 = vst.msk [vmem:[%s886_s25 + $0x120] sm:$0xff] %vm508_vm0, %v480_v13  ;;  %v289_v8 = vmul.f32 %v692_v0, %v1354_v59  ;;  %546 = vst.msk [vmem:[%s886_s25 + $0x128] sm:$0xff] %vm508_vm0, %v481_v18  ;;  %v420_v9 = vmul.f32 0.2, %v356_v23  ;;  %v357_v62 = vadd.f32 %v704_v1, %v286_v31  ;;  %v290_v37 = vmul.f32 %v692_v0, %v1355_v10  ;;  %v1364_v18 = vld [vmem:[#allocation17_spill] sm:$0xff] }
  0x44   : > { %547 = vst.msk [vmem:[%s886_s25 + $0x130] sm:$0xff] %vm508_vm0, %v482_v19  ;;  %v291_v39 = vmul.f32 %v692_v0, %v1356_v38  ;;  %548 = vst.msk [vmem:[%s886_s25 + $0x138] sm:$0xff] %vm508_vm0, %v483_v32  ;;  %v358_v63 = vadd.f32 %v704_v1, %v287_v50  ;;  %v359_v11 = vadd.f32 %v704_v1, %v288_v58 }
  0x45   : > { %v360_v52 = vadd.f32 %v704_v1, %v289_v8  ;;  %v292_v56 = vmul.f32 %v692_v0, %v1357_v53  ;;  %v484_v2 = vmax.f32 %v356_v23, %v420_v9  ;;  %v421_v4 = vmul.f32 0.2, %v357_v62 }
  0x46   : > { %v361_v20 = vadd.f32 %v704_v1, %v290_v37  ;;  %v362_v21 = vadd.f32 %v704_v1, %v291_v39  ;;  %v422_v22 = vmul.f32 0.2, %v358_v63  ;;  %v423_v24 = vmul.f32 0.2, %v359_v11 }
  0x47   : > { %v424_v14 = vmul.f32 0.2, %v360_v52  ;;  %v363_v25 = vadd.f32 %v704_v1, %v292_v56  ;;  %549 = vst.msk [vmem:[%s886_s25 + $0x140] sm:$0xff] %vm508_vm0, %v484_v2  ;;  %v485_v26 = vmax.f32 %v357_v62, %v421_v4  ;;  %v293_v34 = vmul.f32 %v692_v0, %v1358_v29  ;;  %v1365_v62 = vld [vmem:[#allocation18_spill] sm:$0xff]  ;;  %v1366_v56 = vld [vmem:[#allocation19_spill] sm:$0xff] }
  0x48   : > { %v425_v28 = vmul.f32 0.2, %v361_v20  ;;  %v426_v15 = vmul.f32 0.2, %v362_v21  ;;  %v486_v16 = vmax.f32 %v358_v63, %v422_v22  ;;  %v487_v17 = vmax.f32 %v359_v11, %v423_v24  ;;  %v1368_v24 = vld [vmem:[#allocation21_spill] sm:$0xff]  ;;  %v1370_v29 = vld [vmem:[#allocation23_spill] sm:$0xff] }
  0x49   : > { %v488_v51 = vmax.f32 %v360_v52, %v424_v14  ;;  %v427_v35 = vmul.f32 0.2, %v363_v25  ;;  %550 = vst.msk [vmem:[%s886_s25 + $0x148] sm:$0xff] %vm508_vm0, %v485_v26  ;;  %v364_v43 = vadd.f32 %v704_v1, %v293_v34  ;;  %v294_v45 = vmul.f32 %v692_v0, %v1359_v44 }
  0x4a   : > { %v489_v41 = vmax.f32 %v361_v20, %v425_v28  ;;  %v490_v42 = vmax.f32 %v362_v21, %v426_v15  ;;  %551 = vst.msk [vmem:[%s886_s25 + $0x150] sm:$0xff] %vm508_vm0, %v486_v16  ;;  %552 = vst.msk [vmem:[%s886_s25 + $0x158] sm:$0xff] %vm508_vm0, %v487_v17  ;;  %v295_v30 = vmul.f32 %v692_v0, %v1360_v46  ;;  %v1367_v21 = vld [vmem:[#allocation20_spill] sm:$0xff]  ;;  %v1369_v28 = vld [vmem:[#allocation22_spill] sm:$0xff] }
  0x4b   : > { %553 = vst.msk [vmem:[%s886_s25 + $0x160] sm:$0xff] %vm508_vm0, %v488_v51  ;;  %v491_v36 = vmax.f32 %v363_v25, %v427_v35  ;;  %v296_v49 = vmul.f32 %v692_v0, %v1361_v47  ;;  %v297_v55 = vmul.f32 %v692_v0, %v970_v60  ;;  %v428_v61 = vmul.f32 0.2, %v364_v43 }
  0x4c   : > { %554 = vst.msk [vmem:[%s886_s25 + $0x168] sm:$0xff] %vm508_vm0, %v489_v41  ;;  %555 = vst.msk [vmem:[%s886_s25 + $0x170] sm:$0xff] %vm508_vm0, %v490_v42  ;;  %v365_v3 = vadd.f32 %v704_v1, %v294_v45  ;;  %v298_v6 = vmul.f32 %v692_v0, %v1362_v5  ;;  %v299_v54 = vmul.f32 %v692_v0, %v1363_v7 }
  0x4d   : > { %556 = vst.msk [vmem:[%s886_s25 + $0x178] sm:$0xff] %vm508_vm0, %v491_v36  ;;  %v366_v13 = vadd.f32 %v704_v1, %v295_v30  ;;  %v367_v60 = vadd.f32 %v704_v1, %v296_v49  ;;  %v368_v48 = vadd.f32 %v704_v1, %v297_v55  ;;  %v300_v19 = vmul.f32 %v692_v0, %v1364_v18 }
  0x4e   : > { %v492_v23 = vmax.f32 %v364_v43, %v428_v61  ;;  %v429_v27 = vmul.f32 0.2, %v365_v3  ;;  %v369_v31 = vadd.f32 %v704_v1, %v298_v6  ;;  %v370_v32 = vadd.f32 %v704_v1, %v299_v54 }
  0x4f   : > { %v430_v33 = vmul.f32 0.2, %v366_v13  ;;  %v431_v50 = vmul.f32 0.2, %v367_v60  ;;  %v432_v57 = vmul.f32 0.2, %v368_v48  ;;  %v371_v58 = vadd.f32 %v704_v1, %v300_v19 }
  0x50   : > { %557 = vst.msk [vmem:[%s886_s25 + $0x180] sm:$0xff] %vm508_vm0, %v492_v23  ;;  %v493_v59 = vmax.f32 %v365_v3, %v429_v27  ;;  %v433_v8 = vmul.f32 0.2, %v369_v31  ;;  %v434_v9 = vmul.f32 0.2, %v370_v32  ;;  %v301_v10 = vmul.f32 %v692_v0, %v1365_v62 }
  0x51   : > { %v494_v37 = vmax.f32 %v366_v13, %v430_v33  ;;  %v495_v38 = vmax.f32 %v367_v60, %v431_v50  ;;  %v496_v39 = vmax.f32 %v368_v48, %v432_v57  ;;  %v435_v63 = vmul.f32 0.2, %v371_v58 }
  0x52   : > { %558 = vst.msk [vmem:[%s886_s25 + $0x188] sm:$0xff] %vm508_vm0, %v493_v59  ;;  %v497_v11 = vmax.f32 %v369_v31, %v433_v8  ;;  %v498_v52 = vmax.f32 %v370_v32, %v434_v9  ;;  %v372_v53 = vadd.f32 %v704_v1, %v301_v10  ;;  %v302_v2 = vmul.f32 %v692_v0, %v1366_v56 }
  0x53   : > { %559 = vst.msk [vmem:[%s886_s25 + $0x190] sm:$0xff] %vm508_vm0, %v494_v37  ;;  %560 = vst.msk [vmem:[%s886_s25 + $0x198] sm:$0xff] %vm508_vm0, %v495_v38  ;;  %v499_v4 = vmax.f32 %v371_v58, %v435_v63  ;;  %v303_v20 = vmul.f32 %v692_v0, %v988_v12  ;;  %v304_v22 = vmul.f32 %v692_v0, %v1367_v21 }
  0x54   : > { %561 = vst.msk [vmem:[%s886_s25 + $0x1a0] sm:$0xff] %vm508_vm0, %v496_v39  ;;  %v305_v14 = vmul.f32 %v692_v0, %v1368_v24  ;;  %562 = vst.msk [vmem:[%s886_s25 + $0x1a8] sm:$0xff] %vm508_vm0, %v497_v11  ;;  %v436_v25 = vmul.f32 0.2, %v372_v53  ;;  %v373_v26 = vadd.f32 %v704_v1, %v302_v2  ;;  %v306_v15 = vmul.f32 %v692_v0, %v1369_v28 }
  0x55   : > { %563 = vst.msk [vmem:[%s886_s25 + $0x1b0] sm:$0xff] %vm508_vm0, %v498_v52  ;;  %v307_v12 = vmul.f32 %v692_v0, %v1370_v29  ;;  %564 = vst.msk [vmem:[%s886_s25 + $0x1b8] sm:$0xff] %vm508_vm0, %v499_v4  ;;  %v374_v34 = vadd.f32 %v704_v1, %v303_v20  ;;  %v375_v16 = vadd.f32 %v704_v1, %v304_v22 }
  0x56   : > { %v376_v17 = vadd.f32 %v704_v1, %v305_v14  ;;  %v308_v51 = vmul.f32 %v692_v0, %v1013_v40  ;;  %v500_v35 = vmax.f32 %v372_v53, %v436_v25  ;;  %v437_v41 = vmul.f32 0.2, %v373_v26 }
  0x57   : > { %v377_v42 = vadd.f32 %v704_v1, %v306_v15  ;;  %v378_v43 = vadd.f32 %v704_v1, %v307_v12  ;;  %v438_v44 = vmul.f32 0.2, %v374_v34  ;;  %v439_v45 = vmul.f32 0.2, %v375_v16 }
  0x58   : > { %v440_v36 = vmul.f32 0.2, %v376_v17  ;;  %v379_v46 = vadd.f32 %v704_v1, %v308_v51  ;;  %565 = vst.msk [vmem:[%s886_s25 + $0x1c0] sm:$0xff] %vm508_vm0, %v500_v35  ;;  %v501_v0 = vmax.f32 %v373_v26, %v437_v41 }
  0x59   : > { %v441_v40 = vmul.f32 0.2, %v377_v42  ;;  %v442_v30 = vmul.f32 0.2, %v378_v43  ;;  %v502_v47 = vmax.f32 %v374_v34, %v438_v44  ;;  %v503_v49 = vmax.f32 %v375_v16, %v439_v45 }
  0x5a   : > { %v504_v55 = vmax.f32 %v376_v17, %v440_v36  ;;  %v443_v61 = vmul.f32 0.2, %v379_v46  ;;  %566 = vst.msk [vmem:[%s886_s25 + $0x1c8] sm:$0xff] %vm508_vm0, %v501_v0 }
  0x5b   : > { %v505_v3 = vmax.f32 %v377_v42, %v441_v40  ;;  %v506_v5 = vmax.f32 %v378_v43, %v442_v30  ;;  %567 = vst.msk [vmem:[%s886_s25 + $0x1d0] sm:$0xff] %vm508_vm0, %v502_v47  ;;  %568 = vst.msk [vmem:[%s886_s25 + $0x1d8] sm:$0xff] %vm508_vm0, %v503_v49 }
  0x5c   : > { %569 = vst.msk [vmem:[%s886_s25 + $0x1e0] sm:$0xff] %vm508_vm0, %v504_v55  ;;  %v507_v1 = vmax.f32 %v379_v46, %v443_v61 }
  0x5d   : > { %570 = vst.msk [vmem:[%s886_s25 + $0x1e8] sm:$0xff] %vm508_vm0, %v505_v3  ;;  %571 = vst.msk [vmem:[%s886_s25 + $0x1f0] sm:$0xff] %vm508_vm0, %v506_v5 }
  0x5e   : > { %572 = vst.msk [vmem:[%s886_s25 + $0x1f8] sm:$0xff] %vm508_vm0, %v507_v1 }
  0x5f PF: > { %s13_s12 = sadd.s32 1, %s656_s12  }
  0x60   : > { %p10_p4 = scmp.ge.s32.totalorder %s13_s12, 4  }
  0x62   :  { %12 = sbr.rel (!%p10_p4) target bundleno = 1 (0x1), region = 62 }

// kernel: dilated_conv_block.2
= control target key start
LH: loop header
LB: loop body
LE: loop exit
PB: predicated region body
PF: predicated region fallthrough
CT: control target
= control target key end

     0   :  { %s1949_s12 = smov 0   ;;  %s3141_s0 = inlined_call_operand.vmem [shape: bf16[1024,128], index: 0, kind: input, shape index: {}]   ;;  %s3142_s1 = inlined_call_operand.vmem [shape: bf16[128,128], index: 1, kind: input, shape index: {}]   ;;  %s3143_s2 = inlined_call_operand.vmem [shape: f32[1024,8], index: 2, kind: output, shape index: {0}]   ;;  %s3144_s3 = inlined_call_operand.vmem [shape: f32[2,2,128], index: 3, kind: output, shape index: {1}]  }
   0x1 LB: > { %s1955_s13 = sadd.s32 4294967295, %s1927_s12   ;;  %p1679_p0 = scmp.ge.s32.totalorder %s1927_s12, 1  ;;  %s1927_s12 = sphi %s1949_s12, %s14_s12  }
   0x2   : > { %p141_p1 = scmp.lt.s32.totalorder %s1927_s12, 3 }
   0x4   : > { %p142_p2 = pnand %p1679_p0, %p141_p1 }
   0x6   : > { %145 = sbr.rel (%p142_p2) target bundleno = 533 (0x215), region = 28 }
   0xb   : > { %v1879_v0 = vld [vmem:[%s3142_s1 + $0x38] sm:$0xff]   ;;  %s1680_s16 = sshll.u32 %s1955_s13, 6  ;;  %v1880_v1 = vld [vmem:[%s3142_s1 + $0x30] sm:$0xff]   ;;  %v1881_v2 = vld [vmem:[%s3142_s1 + $0x28] sm:$0xff]   ;;  %v860_v40 = vlaneseq  ;;  %s1725_s9 = sshll.u32 %s1955_s13, 9  ;;  %vm795_vm0 = vcmask 64512  }
   0xc   : > { %p170_p3 = scmp.lt.s32.totalorder %s1680_s16, 127  ;;  %1775 = vmatprep.subr.bf16.mxu0 %v1879_v0  ;;  %1855 = vmatprep.subr.bf16.mxu1 %v1879_v0  ;;  %v1882_v3 = vld [vmem:[%s3142_s1 + $0x20] sm:$0xff]   ;;  %v1883_v5 = vld [vmem:[%s3142_s1 + $0x18] sm:$0xff]   ;;  %v1884_v6 = vld [vmem:[%s3142_s1 + $0x10] sm:$0xff]   ;;  %v2037_v44 = vstv %s1725_s9  ;;  %p181_p4 = scmp.lt.s32.totalorder %s1955_s13, 1 }
   0xd   : > { %1776 = vmatpush3.bf16.msra.mxu0 %v1879_v0  ;;  %1863 = vmatpush3.bf16.msra.mxu1 %v1879_v0  ;;  %v1885_v7 = vld [vmem:[%s3142_s1 + $0x8] sm:$0xff]   ;;  %v1886_v8 = vld [vmem:[%s3142_s1] sm:$0xff]   ;;  %v2024_v41 = vshrl.u32 %v860_v40, 7  ;;  %s1055_s17 = ssub.s32 1024, %s1725_s9 }
   0xe   : > { %s3467_s16 = smov (!%p170_p3, %s1680_s16), 127  ;;  %1777 = vmatprep.subr.bf16.mxu0 %v1880_v1  ;;  %1856 = vmatprep.subr.bf16.mxu1 %v1880_v1  ;;  %p1056_p5 = scmp.lt.s32.totalorder %s1055_s17, 512 }
   0xf   : > { %s1681_s21 = sshll.u32 %s3467_s16, 2  ;;  %s1683_s8 = sshll.u32 %s3467_s16, 3  ;;  %v862_v42 = vadd.s32 8, %v2024_v41  ;;  %v863_v43 = vadd.s32 16, %v2024_v41  ;;  %v2043_v46 = vadd.s32 %v2037_v44, %v2024_v41  ;;  %v864_v47 = vadd.s32 24, %v2024_v41 }
  0x10   : > { %s1975_s24 = scalar_lea.vmem %s3141_s0, %s1681_s21  ;;  %s2032_s14 = scalar_lea.vmem %s3143_s2, %s1683_s8  ;;  %v865_v52 = vadd.s32 32, %v2024_v41  ;;  %v866_v56 = vadd.s32 40, %v2024_v41  ;;  %v867_v59 = vadd.s32 48, %v2024_v41 }
  0x11   : > { %1778 = vmatpush3.bf16.msra.mxu0 %v1880_v1  ;;  %1864 = vmatpush3.bf16.msra.mxu1 %v1880_v1  ;;  %v1887_v4 = vld [vmem:[%s1975_s24] sm:$0xff]   ;;  %v1888_v10 = vld [vmem:[%s1975_s24 + $0x8] sm:$0xff]   ;;  %v1889_v11 = vld [vmem:[%s1975_s24 + $0x10] sm:$0xff]   ;;  %v2047_v48 = vadd.s32 %v2037_v44, %v862_v42  ;;  %v2058_v50 = vadd.s32 %v2037_v44, %v863_v43  ;;  %vm991_vm1 = vcmp.lt.s32.totalorder %v2043_v46, 1024  ;;  %v2075_v55 = vadd.s32 %v2037_v44, %v864_v47  ;;  %s182_s15 = scalar_select %p181_p4, %s1955_s13, 1 }
  0x12   : > { %1779 = vmatprep.subr.bf16.mxu0 %v1881_v2  ;;  %1857 = vmatprep.subr.bf16.mxu1 %v1881_v2  ;;  %v1903_v9 = vld [vmem:[%s1975_s24 + $0x80] sm:$0xff]   ;;  %v1904_v12 = vld [vmem:[%s1975_s24 + $0x88] sm:$0xff]   ;;  %v1905_v13 = vld [vmem:[%s1975_s24 + $0x90] sm:$0xff]   ;;  %v2092_v60 = vadd.s32 %v2037_v44, %v865_v52  ;;  %v875_v52 = vadd.s32 112, %v2024_v41  ;;  %s1057_s21 = scalar_select %p1056_p5, %s1055_s17, 512 }
  0x13   : > { %1791 = vmatprep.mubr.bf16.mxu0 %v1887_v4  ;;  %1823 = vmatprep.mubr.bf16.mxu1 %v1903_v9  ;;  %v1890_v14 = vld [vmem:[%s1975_s24 + $0x18] sm:$0xff]   ;;  %v1891_v15 = vld [vmem:[%s1975_s24 + $0x20] sm:$0xff]   ;;  %v1892_v18 = vld [vmem:[%s1975_s24 + $0x28] sm:$0xff]   ;;  %vm992_vm2 = vcmp.lt.s32.totalorder %v2047_v48, 1024  ;;  %vm993_vm3 = vcmp.lt.s32.totalorder %v2058_v50, 1024  ;;  %vm994_vm4 = vcmp.lt.s32.totalorder %v2075_v55, 1024 }
  0x14   : > { %v1906_v16 = vld [vmem:[%s1975_s24 + $0x98] sm:$0xff]   ;;  %v1907_v17 = vld [vmem:[%s1975_s24 + $0xa0] sm:$0xff]   ;;  %v1908_v19 = vld [vmem:[%s1975_s24 + $0xa8] sm:$0xff]   ;;  %vm995_vm5 = vcmp.lt.s32.totalorder %v2092_v60, 1024  ;;  %v869_v9 = vadd.s32 64, %v2024_v41  ;;  %s1684_s16 = sshll.u32 %s182_s15, 1 }
  0x15   : > { %1780 = vmatpush3.bf16.msra.mxu0 %v1881_v2  ;;  %1865 = vmatpush3.bf16.msra.mxu1 %v1881_v2  ;;  %v1893_v20 = vld [vmem:[%s1975_s24 + $0x30] sm:$0xff]   ;;  %v1894_v22 = vld [vmem:[%s1975_s24 + $0x38] sm:$0xff]   ;;  %v1895_v24 = vld [vmem:[%s1975_s24 + $0x40] sm:$0xff]   ;;  %v868_v2 = vadd.s32 56, %v2024_v41  ;;  %s2876_s20 = scalar_lea.vmem %s3144_s3, %s1684_s16  ;;  %p1726_p6 = scmp.gt.s32.totalorder %s1055_s17, 1 }
  0x16   : > { %1781 = vmatprep.subr.bf16.mxu0 %v1882_v3  ;;  %1858 = vmatprep.subr.bf16.mxu1 %v1882_v3  ;;  %v1909_v21 = vld [vmem:[%s1975_s24 + $0xb0] sm:$0xff]   ;;  %v1910_v23 = vld [vmem:[%s1975_s24 + $0xb8] sm:$0xff]   ;;  %v1911_v25 = vld [vmem:[%s1975_s24 + $0xc0] sm:$0xff]  }
  0x17   : > { %v1896_v26 = vld [vmem:[%s1975_s24 + $0x48] sm:$0xff]   ;;  %v1897_v28 = vld [vmem:[%s1975_s24 + $0x50] sm:$0xff]   ;;  %v1898_v30 = vld [vmem:[%s1975_s24 + $0x58] sm:$0xff]   ;;  %s3469_s21 = smov (!%p1726_p6, %s1057_s21), 1 }
  0x18   : > { %v1912_v27 = vld [vmem:[%s1975_s24 + $0xc8] sm:$0xff]   ;;  %v1913_v29 = vld [vmem:[%s1975_s24 + $0xd0] sm:$0xff]   ;;  %v1914_v31 = vld [vmem:[%s1975_s24 + $0xd8] sm:$0xff]   ;;  %s1060_s22 = scvt.s32.f32 %s3469_s21 }
  0x19   : > { %1782 = vmatpush3.bf16.msra.mxu0 %v1882_v3  ;;  %1866 = vmatpush3.bf16.msra.mxu1 %v1882_v3  ;;  %v1899_v32 = vld [vmem:[%s1975_s24 + $0x60] sm:$0xff]   ;;  %v1900_v34 = vld [vmem:[%s1975_s24 + $0x68] sm:$0xff]   ;;  %v1901_v36 = vld [vmem:[%s1975_s24 + $0x70] sm:$0xff]   ;;  %v2113_v3 = vadd.s32 %v2037_v44, %v866_v56 }
  0x1a   : > { %1783 = vmatprep.subr.bf16.mxu0 %v1883_v5  ;;  %1859 = vmatprep.subr.bf16.mxu1 %v1883_v5  ;;  %v1915_v33 = vld [vmem:[%s1975_s24 + $0xe0] sm:$0xff]   ;;  %v1916_v35 = vld [vmem:[%s1975_s24 + $0xe8] sm:$0xff]   ;;  %v1917_v37 = vld [vmem:[%s1975_s24 + $0xf0] sm:$0xff]  }
  0x1b   : > { %v1902_v38 = vld [vmem:[%s1975_s24 + $0x78] sm:$0xff]   ;;  %vm996_vm6 = vcmp.lt.s32.totalorder %v2113_v3, 1024 }
  0x1c   : > { %v1918_v39 = vld [vmem:[%s1975_s24 + $0xf8] sm:$0xff]  }
  0x1d   : > { %1784 = vmatpush3.bf16.msra.mxu0 %v1883_v5  ;;  %1867 = vmatpush3.bf16.msra.mxu1 %v1883_v5 }
  0x1e   : > { %1785 = vmatprep.subr.bf16.mxu0 %v1884_v6  ;;  %1860 = vmatprep.subr.bf16.mxu1 %v1884_v6 }
  0x21   : > { %1786 = vmatpush3.bf16.msra.mxu0 %v1884_v6  ;;  %1868 = vmatpush3.bf16.msra.mxu1 %v1884_v6 }
  0x22   : > { %1787 = vmatprep.subr.bf16.mxu0 %v1885_v7  ;;  %1861 = vmatprep.subr.bf16.mxu1 %v1885_v7 }
  0x25   : > { %1788 = vmatpush3.bf16.msra.mxu0 %v1885_v7  ;;  %1869 = vmatpush3.bf16.msra.mxu1 %v1885_v7  ;;  %v2127_v7 = vadd.s32 %v2037_v44, %v867_v59 }
  0x26   : > { %1789 = vmatprep.subr.bf16.mxu0 %v1886_v8  ;;  %1862 = vmatprep.subr.bf16.mxu1 %v1886_v8 }
  0x27   : > { %3268 = vst [vmem:[#allocation2_spill] sm:$0xff] %v2127_v7  ;;  %vm997_vm7 = vcmp.lt.s32.totalorder %v2127_v7, 1024 }
  0x29   : > { %1790 = vmatpush3.bf16.msra.mxu0 %v1886_v8  ;;  %1870 = vmatpush3.bf16.msra.mxu1 %v1886_v8 }
  0x2c   : > { %1792 = vmatmul.mubr.bf16.vlgmr.msra.gmra.mxu0 %v1888_v10  ;;  %1824 = vmatmul.mubr.bf16.vlgmr.msra.gmra.mxu1 %v1904_v12 }
  0x2d   : > { %1795 = vmatprep.mubr.bf16.mxu0 %v1889_v11  ;;  %1827 = vmatprep.mubr.bf16.mxu1 %v1905_v13 }
  0x34   : > { %1796 = vmatmul.mubr.bf16.gmra.mxu0 %v1890_v14  ;;  %1828 = vmatmul.mubr.bf16.gmra.mxu1 %v1906_v16  ;;  %v2147_v14 = vadd.s32 %v2037_v44, %v868_v2  ;;  %v876_v2 = vadd.s32 120, %v2024_v41 }
  0x35   : > { %1799 = vmatprep.mubr.bf16.mxu0 %v1891_v15  ;;  %1831 = vmatprep.mubr.bf16.mxu1 %v1907_v17  ;;  %v870_v15 = vadd.s32 72, %v2024_v41 }
  0x36   : > { %3269 = vst [vmem:[#allocation3_spill] sm:$0xff] %v2147_v14  ;;  %vm998_vm8 = vcmp.lt.s32.totalorder %v2147_v14, 1024  ;;  %v894_v14 = vadd.s32 264, %v2024_v41 }
  0x3c   : > { %1800 = vmatmul.mubr.bf16.gmra.mxu0 %v1892_v18  ;;  %1832 = vmatmul.mubr.bf16.gmra.mxu1 %v1908_v19 }
  0x3d   : > { %1803 = vmatprep.mubr.bf16.mxu0 %v1893_v20  ;;  %1835 = vmatprep.mubr.bf16.mxu1 %v1909_v21  ;;  %v871_v20 = vadd.s32 80, %v2024_v41  ;;  %v2167_v21 = vadd.s32 %v2037_v44, %v869_v9 }
  0x3f   : > { %3270 = vst [vmem:[#allocation4_spill] sm:$0xff] %v2167_v21  ;;  %vm999_vm9 = vcmp.lt.s32.totalorder %v2167_v21, 1024 }
  0x44   : > { %1804 = vmatmul.mubr.bf16.gmra.mxu0 %v1894_v22  ;;  %1836 = vmatmul.mubr.bf16.gmra.mxu1 %v1910_v23 }
  0x45   : > { %1807 = vmatprep.mubr.bf16.mxu0 %v1895_v24  ;;  %1839 = vmatprep.mubr.bf16.mxu1 %v1911_v25 }
  0x4c   : > { %1808 = vmatmul.mubr.bf16.gmra.mxu0 %v1896_v26  ;;  %1840 = vmatmul.mubr.bf16.gmra.mxu1 %v1912_v27  ;;  %v872_v26 = vadd.s32 88, %v2024_v41  ;;  %v2185_v27 = vadd.s32 %v2037_v44, %v870_v15 }
  0x4d   : > { %1811 = vmatprep.mubr.bf16.mxu0 %v1897_v28  ;;  %1843 = vmatprep.mubr.bf16.mxu1 %v1913_v29 }
  0x4e   : > { %3272 = vst [vmem:[#allocation6_spill] sm:$0xff] %v2185_v27  ;;  %vm1000_vm10 = vcmp.lt.s32.totalorder %v2185_v27, 1024  ;;  %v890_v27 = vadd.s32 232, %v2024_v41 }
  0x50   : > { %v2545_v21 = vadd.s32 %v2037_v44, %v890_v27 }
  0x52   : > { %3311 = vst [vmem:[#allocation45_spill] sm:$0xff] %v2545_v21 }
  0x54   : > { %1812 = vmatmul.mubr.bf16.gmra.mxu0 %v1898_v30  ;;  %1844 = vmatmul.mubr.bf16.gmra.mxu1 %v1914_v31  ;;  %v2199_v31 = vadd.s32 %v2037_v44, %v871_v20 }
  0x55   : > { %1815 = vmatprep.mubr.bf16.mxu0 %v1899_v32  ;;  %1847 = vmatprep.mubr.bf16.mxu1 %v1915_v33  ;;  %v873_v33 = vadd.s32 96, %v2024_v41 }
  0x56   : > { %3273 = vst [vmem:[#allocation7_spill] sm:$0xff] %v2199_v31  ;;  %vm1001_vm11 = vcmp.lt.s32.totalorder %v2199_v31, 1024 }
  0x57   : > { %v2239_v56 = vadd.s32 %v2037_v44, %v873_v33 }
  0x59   : > { %3278 = vst [vmem:[#allocation12_spill] sm:$0xff] %v2239_v56  ;;  %vm3145_vm13 = vcmp.lt.s32.totalorder %v2239_v56, 1024 }
  0x5c   : > { %1816 = vmatmul.mubr.bf16.gmra.mxu0 %v1900_v34  ;;  %1848 = vmatmul.mubr.bf16.gmra.mxu1 %v1916_v35 }
  0x5d   : > { %1819 = vmatprep.mubr.bf16.mxu0 %v1901_v36  ;;  %1851 = vmatprep.mubr.bf16.mxu1 %v1917_v37 }
  0x64   : > { %1820 = vmatmul.mubr.bf16.gmra.mxu0 %v1902_v38  ;;  %1852 = vmatmul.mubr.bf16.gmra.mxu1 %v1918_v39  ;;  %v2219_v38 = vadd.s32 %v2037_v44, %v872_v26  ;;  %v874_v39 = vadd.s32 104, %v2024_v41  ;;  %v2291_v26 = vadd.s32 %v2037_v44, %v876_v2  ;;  %v880_v2 = vadd.s32 152, %v2024_v41 }
  0x66   : > { %3276 = vst [vmem:[#allocation10_spill] sm:$0xff] %v2219_v38  ;;  %vm1002_vm12 = vcmp.lt.s32.totalorder %v2219_v38, 1024  ;;  %3284 = vst [vmem:[#allocation18_spill] sm:$0xff] %v2291_v26  ;;  %v886_v38 = vadd.s32 200, %v2024_v41 }
  0x68   : > { %v2473_v31 = vadd.s32 %v2037_v44, %v886_v38 }
  0x6a   : > { %3304 = vst [vmem:[#allocation38_spill] sm:$0xff] %v2473_v31 }
  0xec   : > { %v2039_v45 = vpop.f32.mrf.mxu0  ;;  %v2049_v49 = vpop.f32.mrf.mxu1 }
  0xed   : > { %798 = vst.msk [vmem:[%s2032_s14 + $0x10] sm:$0xff] %vm795_vm0, %v2039_v45  ;;  %830 = vst.msk [vmem:[%s2032_s14 + $0x110] sm:$0xff] %vm795_vm0, %v2049_v49  ;;  %v1191_v5 = vsel %vm993_vm3, %v2039_v45, 0.0 }
  0xee   : > { %v2060_v51 = vpop.f32.mrf.mxu0  ;;  %v2063_v53 = vpop.f32.mrf.mxu1 }
  0xef   : > { %796 = vst.msk [vmem:[%s2032_s14] sm:$0xff] %vm795_vm0, %v2060_v51  ;;  %828 = vst.msk [vmem:[%s2032_s14 + $0x100] sm:$0xff] %vm795_vm0, %v2063_v53  ;;  %v1189_v62 = vsel %vm991_vm1, %v2060_v51, 0.0 }
  0xf0   : > { %v2072_v54 = vpop.f32.mrf.mxu0  ;;  %v2079_v57 = vpop.f32.mrf.mxu1 }
  0xf1   : > { %799 = vst.msk [vmem:[%s2032_s14 + $0x18] sm:$0xff] %vm795_vm0, %v2072_v54  ;;  %831 = vst.msk [vmem:[%s2032_s14 + $0x118] sm:$0xff] %vm795_vm0, %v2079_v57  ;;  %v1192_v11 = vsel %vm994_vm4, %v2072_v54, 0.0 }
  0xf2   : > { %v2088_v58 = vpop.f32.mrf.mxu0  ;;  %v2094_v61 = vpop.f32.mrf.mxu1 }
  0xf3   : > { %797 = vst.msk [vmem:[%s2032_s14 + $0x8] sm:$0xff] %vm795_vm0, %v2088_v58  ;;  %v1190_v63 = vsel %vm992_vm2, %v2088_v58, 0.0  ;;  %829 = vst.msk [vmem:[%s2032_s14 + $0x108] sm:$0xff] %vm795_vm0, %v2094_v61 }
  0xf4   : > { %v1253_v0 = vadd.f32 %v1190_v63, %v1189_v62  ;;  %v2109_v1 = vpop.f32.mrf.mxu0  ;;  %v2115_v4 = vpop.f32.mrf.mxu1 }
  0xf5   : > { %802 = vst.msk [vmem:[%s2032_s14 + $0x30] sm:$0xff] %vm795_vm0, %v2109_v1  ;;  %834 = vst.msk [vmem:[%s2032_s14 + $0x130] sm:$0xff] %vm795_vm0, %v2115_v4  ;;  %v1195_v29 = vsel %vm997_vm7, %v2109_v1, 0.0 }
  0xf6   : > { %v1254_v6 = vadd.f32 %v1253_v0, %v1191_v5  ;;  %v2129_v8 = vpop.f32.mrf.mxu0  ;;  %v2133_v10 = vpop.f32.mrf.mxu1  ;;  %v2257_v5 = vadd.s32 %v2037_v44, %v874_v39  ;;  %v879_v39 = vadd.s32 144, %v2024_v41 }
  0xf7   : > { %800 = vst.msk [vmem:[%s2032_s14 + $0x20] sm:$0xff] %vm795_vm0, %v2129_v8  ;;  %832 = vst.msk [vmem:[%s2032_s14 + $0x120] sm:$0xff] %vm795_vm0, %v2133_v10  ;;  %v1193_v17 = vsel %vm995_vm5, %v2129_v8, 0.0 }
  0xf8   : > { %v1255_v12 = vadd.f32 %v1254_v6, %v1192_v11  ;;  %v2144_v13 = vpop.f32.mrf.mxu0  ;;  %v2151_v16 = vpop.f32.mrf.mxu1  ;;  %3280 = vst [vmem:[#allocation14_spill] sm:$0xff] %v2257_v5  ;;  %vm3146_vm14 = vcmp.lt.s32.totalorder %v2257_v5, 1024 }
  0xf9   : > { %803 = vst.msk [vmem:[%s2032_s14 + $0x38] sm:$0xff] %vm795_vm0, %v2144_v13  ;;  %835 = vst.msk [vmem:[%s2032_s14 + $0x138] sm:$0xff] %vm795_vm0, %v2151_v16  ;;  %v1196_v35 = vsel %vm998_vm8, %v2144_v13, 0.0 }
  0xfa   : > { %v1256_v18 = vadd.f32 %v1255_v12, %v1193_v17  ;;  %v2163_v19 = vpop.f32.mrf.mxu0  ;;  %v2169_v22 = vpop.f32.mrf.mxu1  ;;  %v2271_v12 = vadd.s32 %v2037_v44, %v875_v52  ;;  %v877_v17 = vadd.s32 128, %v2024_v41 }
  0xfb   : > { %801 = vst.msk [vmem:[%s2032_s14 + $0x28] sm:$0xff] %vm795_vm0, %v2163_v19  ;;  %v1194_v23 = vsel %vm996_vm6, %v2163_v19, 0.0  ;;  %833 = vst.msk [vmem:[%s2032_s14 + $0x128] sm:$0xff] %vm795_vm0, %v2169_v22 }
  0xfc   : > { %v1257_v24 = vadd.f32 %v1256_v18, %v1194_v23  ;;  %v2181_v25 = vpop.f32.mrf.mxu0  ;;  %v2187_v28 = vpop.f32.mrf.mxu1  ;;  %3281 = vst [vmem:[#allocation15_spill] sm:$0xff] %v2271_v12  ;;  %vm3147_vm15 = vcmp.lt.s32.totalorder %v2271_v12, 1024  ;;  %v882_v12 = vadd.s32 168, %v2024_v41 }
  0xfd   : > { %3271 = vst [vmem:[#allocation5_spill] sm:$0xff] %v2181_v25  ;;  %806 = vst.msk [vmem:[%s2032_s14 + $0x50] sm:$0xff] %vm795_vm0, %v2181_v25  ;;  %v1199_v9 = vsel %vm1001_vm11, %v2181_v25, 0.0 }
  0xfe   : > { %838 = vst.msk [vmem:[%s2032_s14 + $0x150] sm:$0xff] %vm795_vm0, %v2187_v28  ;;  %v1258_v30 = vadd.f32 %v1257_v24, %v1195_v29  ;;  %v2201_v32 = vpop.f32.mrf.mxu0  ;;  %v2205_v34 = vpop.f32.mrf.mxu1  ;;  %v878_v29 = vadd.s32 136, %v2024_v41  ;;  %v2401_v56 = vadd.s32 %v2037_v44, %v882_v12 }
  0xff   : > { %3274 = vst [vmem:[#allocation8_spill] sm:$0xff] %v2201_v32  ;;  %804 = vst.msk [vmem:[%s2032_s14 + $0x40] sm:$0xff] %vm795_vm0, %v2201_v32  ;;  %v1197_v42 = vsel %vm999_vm9, %v2201_v32, 0.0 }
 0x100   : > { %836 = vst.msk [vmem:[%s2032_s14 + $0x140] sm:$0xff] %vm795_vm0, %v2205_v34  ;;  %v1259_v36 = vadd.f32 %v1258_v30, %v1196_v35  ;;  %v2216_v37 = vpop.f32.mrf.mxu0  ;;  %v2223_v40 = vpop.f32.mrf.mxu1  ;;  %3296 = vst [vmem:[#allocation30_spill] sm:$0xff] %v2401_v56 }
 0x101   : > { %3275 = vst [vmem:[#allocation9_spill] sm:$0xff] %v2216_v37  ;;  %807 = vst.msk [vmem:[%s2032_s14 + $0x58] sm:$0xff] %vm795_vm0, %v2216_v37  ;;  %v1200_v20 = vsel %vm1002_vm12, %v2216_v37, 0.0 }
 0x102   : > { %839 = vst.msk [vmem:[%s2032_s14 + $0x158] sm:$0xff] %vm795_vm0, %v2223_v40  ;;  %v1260_v43 = vadd.f32 %v1259_v36, %v1197_v42  ;;  %v2235_v47 = vpop.f32.mrf.mxu0  ;;  %v2241_v59 = vpop.f32.mrf.mxu1  ;;  %v2311_v42 = vadd.s32 %v2037_v44, %v877_v17 }
 0x103   : > { %3277 = vst [vmem:[#allocation11_spill] sm:$0xff] %v2235_v47  ;;  %805 = vst.msk [vmem:[%s2032_s14 + $0x48] sm:$0xff] %vm795_vm0, %v2235_v47  ;;  %v1198_v62 = vsel %vm1000_vm10, %v2235_v47, 0.0 }
 0x104   : > { %837 = vst.msk [vmem:[%s2032_s14 + $0x148] sm:$0xff] %vm795_vm0, %v2241_v59  ;;  %v1261_v63 = vadd.f32 %v1260_v43, %v1198_v62  ;;  %v2253_v0 = vpop.f32.mrf.mxu0  ;;  %v2259_v6 = vpop.f32.mrf.mxu1  ;;  %3286 = vst [vmem:[#allocation20_spill] sm:$0xff] %v2311_v42  ;;  %v3347_v3 = vld [vmem:[#allocation5_spill] sm:$0xff] }
 0x105   : > { %3279 = vst [vmem:[#allocation13_spill] sm:$0xff] %v2253_v0  ;;  %810 = vst.msk [vmem:[%s2032_s14 + $0x70] sm:$0xff] %vm795_vm0, %v2253_v0  ;;  %v1203_v17 = vsel %vm3147_vm15, %v2253_v0, 0.0 }
 0x106   : > { %842 = vst.msk [vmem:[%s2032_s14 + $0x170] sm:$0xff] %vm795_vm0, %v2259_v6  ;;  %v1262_v11 = vadd.f32 %v1261_v63, %v1199_v9  ;;  %v2273_v15 = vpop.f32.mrf.mxu0  ;;  %v2277_v18 = vpop.f32.mrf.mxu1  ;;  %v2329_v9 = vadd.s32 %v2037_v44, %v878_v29  ;;  %v3343_v55 = vld [vmem:[#allocation8_spill] sm:$0xff] }
 0x107   : > { %3282 = vst [vmem:[#allocation16_spill] sm:$0xff] %v2273_v15  ;;  %808 = vst.msk [vmem:[%s2032_s14 + $0x60] sm:$0xff] %vm795_vm0, %v2273_v15  ;;  %v1201_v33 = vsel %vm3145_vm13, %v2273_v15, 0.0  ;;  %vm3151_vm13 = vcmp.lt.s32.totalorder %v2291_v26, 1024 }
 0x108   : > { %840 = vst.msk [vmem:[%s2032_s14 + $0x160] sm:$0xff] %vm795_vm0, %v2277_v18  ;;  %v1263_v23 = vadd.f32 %v1262_v11, %v1200_v20  ;;  %v2288_v24 = vpop.f32.mrf.mxu0  ;;  %v2295_v30 = vpop.f32.mrf.mxu1  ;;  %3288 = vst [vmem:[#allocation22_spill] sm:$0xff] %v2329_v9  ;;  %vm3159_vm15 = vcmp.lt.s32.totalorder %v2329_v9, 1024 }
 0x109   : > { %3283 = vst [vmem:[#allocation17_spill] sm:$0xff] %v2288_v24  ;;  %811 = vst.msk [vmem:[%s2032_s14 + $0x78] sm:$0xff] %vm795_vm0, %v2288_v24 }
 0x10a   : > { %843 = vst.msk [vmem:[%s2032_s14 + $0x178] sm:$0xff] %vm795_vm0, %v2295_v30  ;;  %v1264_v35 = vadd.f32 %v1263_v23, %v1201_v33  ;;  %v2307_v36 = vpop.f32.mrf.mxu0  ;;  %v2313_v43 = vpop.f32.mrf.mxu1  ;;  %v2343_v23 = vadd.s32 %v2037_v44, %v879_v39  ;;  %v881_v33 = vadd.s32 160, %v2024_v41  ;;  %v3345_v60 = vld [vmem:[#allocation11_spill] sm:$0xff] }
 0x10b   : > { %3285 = vst [vmem:[#allocation19_spill] sm:$0xff] %v2307_v36  ;;  %809 = vst.msk [vmem:[%s2032_s14 + $0x68] sm:$0xff] %vm795_vm0, %v2307_v36  ;;  %v1202_v52 = vsel %vm3146_vm14, %v2307_v36, 0.0  ;;  %vm3155_vm14 = vcmp.lt.s32.totalorder %v2311_v42, 1024 }
 0x10c   : > { %841 = vst.msk [vmem:[%s2032_s14 + $0x168] sm:$0xff] %vm795_vm0, %v2313_v43  ;;  %v1265_v62 = vadd.f32 %v1264_v35, %v1202_v52  ;;  %v2325_v63 = vpop.f32.mrf.mxu0  ;;  %v2331_v11 = vpop.f32.mrf.mxu1  ;;  %3289 = vst [vmem:[#allocation23_spill] sm:$0xff] %v2343_v23  ;;  %v1204_v52 = vsel %vm3151_vm13, %v2288_v24, 0.0  ;;  %vm3163_vm13 = vcmp.lt.s32.totalorder %v2343_v23, 1024  ;;  %v2383_v24 = vadd.s32 %v2037_v44, %v881_v33 }
 0x10d   : > { %3287 = vst [vmem:[#allocation21_spill] sm:$0xff] %v2325_v63  ;;  %814 = vst.msk [vmem:[%s2032_s14 + $0x90] sm:$0xff] %vm795_vm0, %v2325_v63  ;;  %v884_v33 = vadd.s32 184, %v2024_v41  ;;  %v1207_v9 = vsel %vm3163_vm13, %v2325_v63, 0.0  ;;  %vm3175_vm13 = vcmp.lt.s32.totalorder %v2401_v56, 1024 }
 0x10e   : > { %846 = vst.msk [vmem:[%s2032_s14 + $0x190] sm:$0xff] %vm795_vm0, %v2331_v11  ;;  %v1266_v20 = vadd.f32 %v1265_v62, %v1203_v17  ;;  %v2345_v29 = vpop.f32.mrf.mxu0  ;;  %v2349_v35 = vpop.f32.mrf.mxu1  ;;  %v2363_v17 = vadd.s32 %v2037_v44, %v880_v2  ;;  %3294 = vst [vmem:[#allocation28_spill] sm:$0xff] %v2383_v24 }
 0x10f   : > { %3290 = vst [vmem:[#allocation24_spill] sm:$0xff] %v2345_v29  ;;  %812 = vst.msk [vmem:[%s2032_s14 + $0x80] sm:$0xff] %vm795_vm0, %v2345_v29  ;;  %v1205_v5 = vsel %vm3155_vm14, %v2345_v29, 0.0 }
 0x110   : > { %844 = vst.msk [vmem:[%s2032_s14 + $0x180] sm:$0xff] %vm795_vm0, %v2349_v35  ;;  %v1267_v39 = vadd.f32 %v1266_v20, %v1204_v52  ;;  %v2360_v62 = vpop.f32.mrf.mxu0  ;;  %3292 = vst [vmem:[#allocation26_spill] sm:$0xff] %v2363_v17  ;;  %v2367_v26 = vpop.f32.mrf.mxu1  ;;  %v883_v52 = vadd.s32 176, %v2024_v41  ;;  %vm3167_vm14 = vcmp.lt.s32.totalorder %v2363_v17, 1024 }
 0x111   : > { %3291 = vst [vmem:[#allocation25_spill] sm:$0xff] %v2360_v62  ;;  %815 = vst.msk [vmem:[%s2032_s14 + $0x98] sm:$0xff] %vm795_vm0, %v2360_v62  ;;  %v1208_v63 = vsel %vm3167_vm14, %v2360_v62, 0.0 }
 0x112   : > { %847 = vst.msk [vmem:[%s2032_s14 + $0x198] sm:$0xff] %vm795_vm0, %v2367_v26  ;;  %v1268_v2 = vadd.f32 %v1267_v39, %v1205_v5  ;;  %v2379_v20 = vpop.f32.mrf.mxu0  ;;  %v2385_v42 = vpop.f32.mrf.mxu1 }
 0x113   : > { %3293 = vst [vmem:[#allocation27_spill] sm:$0xff] %v2379_v20  ;;  %813 = vst.msk [vmem:[%s2032_s14 + $0x88] sm:$0xff] %vm795_vm0, %v2379_v20  ;;  %v1206_v29 = vsel %vm3159_vm15, %v2379_v20, 0.0  ;;  %vm3171_vm15 = vcmp.lt.s32.totalorder %v2383_v24, 1024  ;;  %v885_v20 = vadd.s32 192, %v2024_v41 }
 0x114   : > { %845 = vst.msk [vmem:[%s2032_s14 + $0x188] sm:$0xff] %vm795_vm0, %v2385_v42  ;;  %v1269_v5 = vadd.f32 %v1268_v2, %v1206_v29  ;;  %v2397_v39 = vpop.f32.mrf.mxu0  ;;  %v2403_v0 = vpop.f32.mrf.mxu1  ;;  %v2415_v2 = vadd.s32 %v2037_v44, %v883_v52 }
 0x115   : > { %3295 = vst [vmem:[#allocation29_spill] sm:$0xff] %v2397_v39  ;;  %818 = vst.msk [vmem:[%s2032_s14 + $0xb0] sm:$0xff] %vm795_vm0, %v2397_v39  ;;  %v2455_v36 = vadd.s32 %v2037_v44, %v885_v20  ;;  %v888_v20 = vadd.s32 216, %v2024_v41 }
 0x116   : > { %850 = vst.msk [vmem:[%s2032_s14 + $0x1b0] sm:$0xff] %vm795_vm0, %v2403_v0  ;;  %v1270_v29 = vadd.f32 %v1269_v5, %v1207_v9  ;;  %3297 = vst [vmem:[#allocation31_spill] sm:$0xff] %v2415_v2  ;;  %v2417_v12 = vpop.f32.mrf.mxu0  ;;  %v2421_v23 = vpop.f32.mrf.mxu1  ;;  %v2435_v5 = vadd.s32 %v2037_v44, %v884_v33  ;;  %vm3179_vm14 = vcmp.lt.s32.totalorder %v2415_v2, 1024 }
 0x117   : > { %3298 = vst [vmem:[#allocation32_spill] sm:$0xff] %v2417_v12  ;;  %816 = vst.msk [vmem:[%s2032_s14 + $0xa0] sm:$0xff] %vm795_vm0, %v2417_v12  ;;  %v1209_v62 = vsel %vm3171_vm15, %v2417_v12, 0.0  ;;  %v1211_v56 = vsel %vm3179_vm14, %v2397_v39, 0.0  ;;  %vm3191_vm14 = vcmp.lt.s32.totalorder %v2473_v31, 1024 }
 0x118   : > { %848 = vst.msk [vmem:[%s2032_s14 + $0x1a0] sm:$0xff] %vm795_vm0, %v2421_v23  ;;  %v1271_v9 = vadd.f32 %v1270_v29, %v1208_v63  ;;  %v2432_v52 = vpop.f32.mrf.mxu0  ;;  %3300 = vst [vmem:[#allocation34_spill] sm:$0xff] %v2435_v5  ;;  %v2439_v17 = vpop.f32.mrf.mxu1  ;;  %v887_v29 = vadd.s32 208, %v2024_v41  ;;  %vm3183_vm15 = vcmp.lt.s32.totalorder %v2435_v5, 1024 }
 0x119   : > { %3299 = vst [vmem:[#allocation33_spill] sm:$0xff] %v2432_v52  ;;  %819 = vst.msk [vmem:[%s2032_s14 + $0xb8] sm:$0xff] %vm795_vm0, %v2432_v52  ;;  %v1212_v39 = vsel %vm3183_vm15, %v2432_v52, 0.0 }
 0x11a   : > { %851 = vst.msk [vmem:[%s2032_s14 + $0x1b8] sm:$0xff] %vm795_vm0, %v2439_v17  ;;  %v1272_v63 = vadd.f32 %v1271_v9, %v1209_v62  ;;  %v2451_v33 = vpop.f32.mrf.mxu0  ;;  %3302 = vst [vmem:[#allocation36_spill] sm:$0xff] %v2455_v36  ;;  %v2457_v24 = vpop.f32.mrf.mxu1 }
 0x11b   : > { %3301 = vst [vmem:[#allocation35_spill] sm:$0xff] %v2451_v33  ;;  %817 = vst.msk [vmem:[%s2032_s14 + $0xa8] sm:$0xff] %vm795_vm0, %v2451_v33  ;;  %v1210_v12 = vsel %vm3175_vm13, %v2451_v33, 0.0  ;;  %vm3187_vm13 = vcmp.lt.s32.totalorder %v2455_v36, 1024  ;;  %v889_v33 = vadd.s32 224, %v2024_v41 }
 0x11c   : > { %849 = vst.msk [vmem:[%s2032_s14 + $0x1a8] sm:$0xff] %vm795_vm0, %v2457_v24  ;;  %v1273_v62 = vadd.f32 %v1272_v63, %v1210_v12  ;;  %v2469_v9 = vpop.f32.mrf.mxu0  ;;  %v2475_v15 = vpop.f32.mrf.mxu1  ;;  %v2487_v63 = vadd.s32 %v2037_v44, %v887_v29 }
 0x11d   : > { %3303 = vst [vmem:[#allocation37_spill] sm:$0xff] %v2469_v9  ;;  %822 = vst.msk [vmem:[%s2032_s14 + $0xd0] sm:$0xff] %vm795_vm0, %v2469_v9  ;;  %v2527_v37 = vadd.s32 %v2037_v44, %v889_v33  ;;  %v892_v33 = vadd.s32 248, %v2024_v41 }
 0x11e   : > { %854 = vst.msk [vmem:[%s2032_s14 + $0x1d0] sm:$0xff] %vm795_vm0, %v2475_v15  ;;  %v1274_v12 = vadd.f32 %v1273_v62, %v1211_v56  ;;  %3305 = vst [vmem:[#allocation39_spill] sm:$0xff] %v2487_v63  ;;  %v2489_v38 = vpop.f32.mrf.mxu0  ;;  %v2493_v2 = vpop.f32.mrf.mxu1  ;;  %v2507_v62 = vadd.s32 %v2037_v44, %v888_v20  ;;  %vm3195_vm15 = vcmp.lt.s32.totalorder %v2487_v63, 1024 }
 0x11f   : > { %3306 = vst [vmem:[#allocation40_spill] sm:$0xff] %v2489_v38  ;;  %820 = vst.msk [vmem:[%s2032_s14 + $0xc0] sm:$0xff] %vm795_vm0, %v2489_v38  ;;  %v1213_v52 = vsel %vm3187_vm13, %v2489_v38, 0.0  ;;  %v1215_v31 = vsel %vm3195_vm15, %v2469_v9, 0.0  ;;  %vm3206_vm15 = vcmp.lt.s32.totalorder %v2545_v21, 1024 }
 0x120   : > { %852 = vst.msk [vmem:[%s2032_s14 + $0x1c0] sm:$0xff] %vm795_vm0, %v2493_v2  ;;  %v1275_v56 = vadd.f32 %v1274_v12, %v1212_v39  ;;  %v2504_v29 = vpop.f32.mrf.mxu0  ;;  %3308 = vst [vmem:[#allocation42_spill] sm:$0xff] %v2507_v62  ;;  %v2511_v5 = vpop.f32.mrf.mxu1  ;;  %v891_v12 = vadd.s32 240, %v2024_v41  ;;  %vm3199_vm13 = vcmp.lt.s32.totalorder %v2507_v62, 1024 }
 0x121   : > { %3307 = vst [vmem:[#allocation41_spill] sm:$0xff] %v2504_v29  ;;  %823 = vst.msk [vmem:[%s2032_s14 + $0xd8] sm:$0xff] %vm795_vm0, %v2504_v29  ;;  %v1216_v9 = vsel %vm3199_vm13, %v2504_v29, 0.0 }
 0x122   : > { %855 = vst.msk [vmem:[%s2032_s14 + $0x1d8] sm:$0xff] %vm795_vm0, %v2511_v5  ;;  %v1276_v39 = vadd.f32 %v1275_v56, %v1213_v52  ;;  %v2523_v20 = vpop.f32.mrf.mxu0  ;;  %3310 = vst [vmem:[#allocation44_spill] sm:$0xff] %v2527_v37  ;;  %v2529_v36 = vpop.f32.mrf.mxu1 }
 0x123   : > { %3309 = vst [vmem:[#allocation43_spill] sm:$0xff] %v2523_v20  ;;  %821 = vst.msk [vmem:[%s2032_s14 + $0xc8] sm:$0xff] %vm795_vm0, %v2523_v20  ;;  %v1214_v38 = vsel %vm3191_vm14, %v2523_v20, 0.0  ;;  %vm3203_vm14 = vcmp.lt.s32.totalorder %v2527_v37, 1024  ;;  %v893_v20 = vadd.s32 256, %v2024_v41 }
 0x124   : > { %853 = vst.msk [vmem:[%s2032_s14 + $0x1c8] sm:$0xff] %vm795_vm0, %v2529_v36  ;;  %v1277_v52 = vadd.f32 %v1276_v39, %v1214_v38  ;;  %v2541_v56 = vpop.f32.mrf.mxu0  ;;  %v2547_v25 = vpop.f32.mrf.mxu1  ;;  %v2559_v39 = vadd.s32 %v2037_v44, %v891_v12 }
 0x125   : > { %826 = vst.msk [vmem:[%s2032_s14 + $0xf0] sm:$0xff] %vm795_vm0, %v2541_v56  ;;  %858 = vst.msk [vmem:[%s2032_s14 + $0x1f0] sm:$0xff] %vm795_vm0, %v2547_v25 }
 0x126   : > { %v1278_v38 = vadd.f32 %v1277_v52, %v1215_v31  ;;  %3312 = vst [vmem:[#allocation46_spill] sm:$0xff] %v2559_v39  ;;  %v2561_v27 = vpop.f32.mrf.mxu0  ;;  %v2565_v63 = vpop.f32.mrf.mxu1  ;;  %v2579_v52 = vadd.s32 %v2037_v44, %v892_v33  ;;  %vm3210_vm13 = vcmp.lt.s32.totalorder %v2559_v39, 1024  ;;  %v895_v33 = vadd.s32 272, %v2024_v41 }
 0x127   : > { %3313 = vst [vmem:[#allocation47_spill] sm:$0xff] %v2561_v27  ;;  %824 = vst.msk [vmem:[%s2032_s14 + $0xe0] sm:$0xff] %vm795_vm0, %v2561_v27  ;;  %v1217_v29 = vsel %vm3203_vm14, %v2561_v27, 0.0  ;;  %v1219_v27 = vsel %vm3210_vm13, %v2541_v56, 0.0  ;;  %v898_v39 = vadd.s32 296, %v2024_v41 }
 0x128   : > { %856 = vst.msk [vmem:[%s2032_s14 + $0x1e0] sm:$0xff] %vm795_vm0, %v2565_v63  ;;  %v1279_v31 = vadd.f32 %v1278_v38, %v1216_v9  ;;  %v2576_v12 = vpop.f32.mrf.mxu0  ;;  %3314 = vst [vmem:[#allocation48_spill] sm:$0xff] %v2579_v52  ;;  %v2583_v62 = vpop.f32.mrf.mxu1  ;;  %v2597_v38 = vadd.s32 %v2037_v44, %v893_v20  ;;  %vm3212_vm14 = vcmp.lt.s32.totalorder %v2579_v52, 1024  ;;  %v896_v20 = vadd.s32 280, %v2024_v41 }
 0x129   : > { %827 = vst.msk [vmem:[%s2032_s14 + $0xf8] sm:$0xff] %vm795_vm0, %v2576_v12  ;;  %859 = vst.msk [vmem:[%s2032_s14 + $0x1f8] sm:$0xff] %vm795_vm0, %v2583_v62  ;;  %v2621_v32 = vadd.s32 %v2037_v44, %v895_v33 }
 0x12a   : > { %v1280_v9 = vadd.f32 %v1279_v31, %v1217_v29  ;;  %3315 = vst [vmem:[#allocation49_spill] sm:$0xff] %v2597_v38  ;;  %v2599_v47 = vpop.f32.mrf.mxu0  ;;  %v2601_v7 = vpop.f32.mrf.mxu1  ;;  %v2615_v31 = vadd.s32 %v2037_v44, %v894_v14  ;;  %v2629_v14 = vadd.s32 %v2037_v44, %v896_v20 }
 0x12b   : > { %3316 = vst [vmem:[#allocation50_spill] sm:$0xff] %v2599_v47  ;;  %825 = vst.msk [vmem:[%s2032_s14 + $0xe8] sm:$0xff] %vm795_vm0, %v2599_v47  ;;  %v1218_v37 = vsel %vm3206_vm15, %v2599_v47, 0.0  ;;  %vm3214_vm15 = vcmp.lt.s32.totalorder %v2597_v38, 1024  ;;  %v897_v47 = vadd.s32 288, %v2024_v41  ;;  %vm3218_vm13 = vcmp.lt.s32.totalorder %v2621_v32, 1024 }
 0x12c   : > { %857 = vst.msk [vmem:[%s2032_s14 + $0x1e8] sm:$0xff] %vm795_vm0, %v2601_v7  ;;  %v1281_v29 = vadd.f32 %v1280_v9, %v1218_v37  ;;  %3317 = vst [vmem:[#allocation51_spill] sm:$0xff] %v2615_v31  ;;  %v1220_v37 = vsel %vm3212_vm14, %v2576_v12, 0.0  ;;  %vm3216_vm0 = vcmp.lt.s32.totalorder %v2615_v31, 1024  ;;  %v1221_v33 = vsel %vm3214_vm15, %v2063_v53, 0.0 }
 0x12d   : > { %3318 = vst [vmem:[#allocation52_spill] sm:$0xff] %v2621_v32  ;;  %3319 = vst [vmem:[#allocation53_spill] sm:$0xff] %v2629_v14  ;;  %v2639_v52 = vadd.s32 %v2037_v44, %v897_v47  ;;  %vm3220_vm14 = vcmp.lt.s32.totalorder %v2629_v14, 1024  ;;  %v2647_v38 = vadd.s32 %v2037_v44, %v898_v39  ;;  %v901_v31 = vadd.s32 320, %v2024_v41 }
 0x12e   : > { %v1282_v21 = vadd.f32 %v1281_v29, %v1219_v27  ;;  %v899_v29 = vadd.s32 304, %v2024_v41  ;;  %v902_v32 = vadd.s32 328, %v2024_v41 }
 0x12f   : > { %3320 = vst [vmem:[#allocation54_spill] sm:$0xff] %v2639_v52  ;;  %3321 = vst [vmem:[#allocation55_spill] sm:$0xff] %v2647_v38  ;;  %vm3222_vm15 = vcmp.lt.s32.totalorder %v2639_v52, 1024  ;;  %v2671_v14 = vadd.s32 %v2037_v44, %v901_v31 }
 0x130   : > { %v1283_v9 = vadd.f32 %v1282_v21, %v1220_v37  ;;  %v1222_v21 = vsel %vm3216_vm0, %v2094_v61, 0.0  ;;  %v900_v37 = vadd.s32 312, %v2024_v41  ;;  %v2653_v47 = vadd.s32 %v2037_v44, %v899_v29 }
 0x131   : > { %vm3224_vm0 = vcmp.lt.s32.totalorder %v2647_v38, 1024  ;;  %v1225_v29 = vsel %vm3222_vm15, %v2133_v10, 0.0  ;;  %3324 = vst [vmem:[#allocation58_spill] sm:$0xff] %v2671_v14  ;;  %v2679_v52 = vadd.s32 %v2037_v44, %v902_v32  ;;  %vm3230_vm15 = vcmp.lt.s32.totalorder %v2671_v14, 1024 }
 0x132   : > { %v1284_v27 = vadd.f32 %v1283_v9, %v1221_v33  ;;  %v1223_v9 = vsel %vm3218_vm13, %v2049_v49, 0.0  ;;  %3322 = vst [vmem:[#allocation56_spill] sm:$0xff] %v2653_v47  ;;  %v2661_v39 = vadd.s32 %v2037_v44, %v900_v37  ;;  %vm3226_vm13 = vcmp.lt.s32.totalorder %v2653_v47, 1024 }
 0x133   : > { %v1226_v37 = vsel %vm3224_vm0, %v2169_v22, 0.0  ;;  %3325 = vst [vmem:[#allocation59_spill] sm:$0xff] %v2679_v52  ;;  %v905_v38 = vadd.s32 352, %v2024_v41  ;;  %vm3232_vm0 = vcmp.lt.s32.totalorder %v2679_v52, 1024  ;;  %v906_v47 = vadd.s32 360, %v2024_v41 }
 0x134   : > { %v1285_v20 = vadd.f32 %v1284_v27, %v1222_v21  ;;  %v1224_v27 = vsel %vm3220_vm14, %v2079_v57, 0.0  ;;  %3323 = vst [vmem:[#allocation57_spill] sm:$0xff] %v2661_v39  ;;  %vm3228_vm14 = vcmp.lt.s32.totalorder %v2661_v39, 1024  ;;  %v909_v52 = vadd.s32 384, %v2024_v41 }
 0x135   : > { %v2703_v39 = vadd.s32 %v2037_v44, %v905_v38  ;;  %v2711_v14 = vadd.s32 %v2037_v44, %v906_v47 }
 0x136   : > { %v1286_v33 = vadd.f32 %v1285_v20, %v1223_v9  ;;  %v903_v9 = vadd.s32 336, %v2024_v41 }
 0x137   : > { %3328 = vst [vmem:[#allocation62_spill] sm:$0xff] %v2703_v39  ;;  %3329 = vst [vmem:[#allocation63_spill] sm:$0xff] %v2711_v14 }
 0x138   : > { %v1287_v21 = vadd.f32 %v1286_v33, %v1224_v27  ;;  %v904_v27 = vadd.s32 344, %v2024_v41  ;;  %v2685_v31 = vadd.s32 %v2037_v44, %v903_v9  ;;  %v1229_v9 = vsel %vm3230_vm15, %v2205_v34, 0.0 }
 0x139   : > { %vm3238_vm15 = vcmp.lt.s32.totalorder %v2703_v39, 1024 }
 0x13a   : > { %v1288_v20 = vadd.f32 %v1287_v21, %v1225_v29  ;;  %v1227_v21 = vsel %vm3226_vm13, %v2115_v4, 0.0  ;;  %3326 = vst [vmem:[#allocation60_spill] sm:$0xff] %v2685_v31  ;;  %v2693_v32 = vadd.s32 %v2037_v44, %v904_v27  ;;  %vm3234_vm13 = vcmp.lt.s32.totalorder %v2685_v31, 1024 }
 0x13b   : > { %v1230_v27 = vsel %vm3232_vm0, %v2241_v59, 0.0  ;;  %vm3240_vm0 = vcmp.lt.s32.totalorder %v2711_v14, 1024  ;;  %v910_v31 = vadd.s32 392, %v2024_v41  ;;  %v913_v14 = vadd.s32 416, %v2024_v41 }
 0x13c   : > { %v1289_v33 = vadd.f32 %v1288_v20, %v1226_v37  ;;  %v1228_v20 = vsel %vm3228_vm14, %v2151_v16, 0.0  ;;  %3327 = vst [vmem:[#allocation61_spill] sm:$0xff] %v2693_v32  ;;  %vm3236_vm14 = vcmp.lt.s32.totalorder %v2693_v32, 1024  ;;  %v2735_v32 = vadd.s32 %v2037_v44, %v909_v52 }
 0x13d   : > { %v2743_v39 = vadd.s32 %v2037_v44, %v910_v31 }
 0x13e   : > { %v1290_v29 = vadd.f32 %v1289_v33, %v1227_v21  ;;  %v907_v21 = vadd.s32 368, %v2024_v41  ;;  %3332 = vst [vmem:[#allocation66_spill] sm:$0xff] %v2735_v32 }
 0x13f   : > { %3333 = vst [vmem:[#allocation67_spill] sm:$0xff] %v2743_v39 }
 0x140   : > { %v1291_v37 = vadd.f32 %v1290_v29, %v1228_v20  ;;  %v908_v20 = vadd.s32 376, %v2024_v41  ;;  %v2717_v38 = vadd.s32 %v2037_v44, %v907_v21  ;;  %v1233_v21 = vsel %vm3238_vm15, %v2277_v18, 0.0 }
 0x141   : > { %vm3246_vm15 = vcmp.lt.s32.totalorder %v2735_v32, 1024 }
 0x142   : > { %v1292_v33 = vadd.f32 %v1291_v37, %v1229_v9  ;;  %v1231_v37 = vsel %vm3234_vm13, %v2187_v28, 0.0  ;;  %3330 = vst [vmem:[#allocation64_spill] sm:$0xff] %v2717_v38  ;;  %v2725_v47 = vadd.s32 %v2037_v44, %v908_v20  ;;  %vm3242_vm13 = vcmp.lt.s32.totalorder %v2717_v38, 1024 }
 0x143   : > { %v1234_v20 = vsel %vm3240_vm0, %v2313_v43, 0.0  ;;  %vm3248_vm0 = vcmp.lt.s32.totalorder %v2743_v39, 1024  ;;  %v914_v38 = vadd.s32 424, %v2024_v41  ;;  %v917_v39 = vadd.s32 448, %v2024_v41 }
 0x144   : > { %v1293_v29 = vadd.f32 %v1292_v33, %v1230_v27  ;;  %v1232_v33 = vsel %vm3236_vm14, %v2223_v40, 0.0  ;;  %3331 = vst [vmem:[#allocation65_spill] sm:$0xff] %v2725_v47  ;;  %vm3244_vm14 = vcmp.lt.s32.totalorder %v2725_v47, 1024  ;;  %v2767_v47 = vadd.s32 %v2037_v44, %v913_v14 }
 0x145   : > { %v2775_v32 = vadd.s32 %v2037_v44, %v914_v38 }
 0x146   : > { %v1294_v9 = vadd.f32 %v1293_v29, %v1231_v37  ;;  %v911_v37 = vadd.s32 400, %v2024_v41  ;;  %3336 = vst [vmem:[#allocation70_spill] sm:$0xff] %v2767_v47 }
 0x147   : > { %3337 = vst [vmem:[#allocation71_spill] sm:$0xff] %v2775_v32 }
 0x148   : > { %v1295_v27 = vadd.f32 %v1294_v9, %v1232_v33  ;;  %v912_v33 = vadd.s32 408, %v2024_v41  ;;  %v2749_v52 = vadd.s32 %v2037_v44, %v911_v37  ;;  %v1237_v37 = vsel %vm3246_vm15, %v2349_v35, 0.0 }
 0x149   : > { %vm3254_vm15 = vcmp.lt.s32.totalorder %v2767_v47, 1024 }
 0x14a   : > { %v1296_v29 = vadd.f32 %v1295_v27, %v1233_v21  ;;  %v1235_v27 = vsel %vm3242_vm13, %v2259_v6, 0.0  ;;  %3334 = vst [vmem:[#allocation68_spill] sm:$0xff] %v2749_v52  ;;  %v2757_v31 = vadd.s32 %v2037_v44, %v912_v33  ;;  %vm3250_vm13 = vcmp.lt.s32.totalorder %v2749_v52, 1024 }
 0x14b   : > { %v1238_v33 = vsel %vm3248_vm0, %v2385_v42, 0.0  ;;  %vm3256_vm0 = vcmp.lt.s32.totalorder %v2775_v32, 1024  ;;  %v918_v52 = vadd.s32 456, %v2024_v41  ;;  %v921_v32 = vadd.s32 480, %v2024_v41 }
 0x14c   : > { %v1297_v9 = vadd.f32 %v1296_v29, %v1234_v20  ;;  %v1236_v29 = vsel %vm3244_vm14, %v2295_v30, 0.0  ;;  %3335 = vst [vmem:[#allocation69_spill] sm:$0xff] %v2757_v31  ;;  %vm3252_vm14 = vcmp.lt.s32.totalorder %v2757_v31, 1024  ;;  %v2799_v31 = vadd.s32 %v2037_v44, %v917_v39 }
 0x14d   : > { %v2807_v47 = vadd.s32 %v2037_v44, %v918_v52 }
 0x14e   : > { %v1298_v21 = vadd.f32 %v1297_v9, %v1235_v27  ;;  %v915_v27 = vadd.s32 432, %v2024_v41  ;;  %3340 = vst [vmem:[#allocation74_spill] sm:$0xff] %v2799_v31 }
 0x150   : > { %v1299_v20 = vadd.f32 %v1298_v21, %v1236_v29  ;;  %v916_v29 = vadd.s32 440, %v2024_v41  ;;  %v2781_v14 = vadd.s32 %v2037_v44, %v915_v27  ;;  %v1241_v27 = vsel %vm3254_vm15, %v2421_v23, 0.0 }
 0x151   : > { %vm3262_vm15 = vcmp.lt.s32.totalorder %v2799_v31, 1024 }
 0x152   : > { %v1300_v9 = vadd.f32 %v1299_v20, %v1237_v37  ;;  %v1239_v20 = vsel %vm3250_vm13, %v2331_v11, 0.0  ;;  %3338 = vst [vmem:[#allocation72_spill] sm:$0xff] %v2781_v14  ;;  %v2789_v38 = vadd.s32 %v2037_v44, %v916_v29  ;;  %vm3258_vm13 = vcmp.lt.s32.totalorder %v2781_v14, 1024 }
 0x153   : > { %v1242_v29 = vsel %vm3256_vm0, %v2457_v24, 0.0  ;;  %vm3263_vm0 = vcmp.lt.s32.totalorder %v2807_v47, 1024  ;;  %v922_v14 = vadd.s32 488, %v2024_v41 }
 0x154   : > { %v1301_v21 = vadd.f32 %v1300_v9, %v1238_v33  ;;  %v1240_v9 = vsel %vm3252_vm14, %v2367_v26, 0.0  ;;  %3339 = vst [vmem:[#allocation73_spill] sm:$0xff] %v2789_v38  ;;  %vm3260_vm14 = vcmp.lt.s32.totalorder %v2789_v38, 1024  ;;  %v2831_v38 = vadd.s32 %v2037_v44, %v921_v32 }
 0x155   : > { %v2839_v31 = vadd.s32 %v2037_v44, %v922_v14 }
 0x156   : > { %v1302_v37 = vadd.f32 %v1301_v21, %v1239_v20  ;;  %v919_v20 = vadd.s32 464, %v2024_v41  ;;  %3341 = vst [vmem:[#allocation75_spill] sm:$0xff] %v2831_v38 }
 0x157   : > { %3342 = vst [vmem:[#allocation76_spill] sm:$0xff] %v2839_v31 }
 0x158   : > { %v1303_v33 = vadd.f32 %v1302_v37, %v1240_v9  ;;  %v920_v9 = vadd.s32 472, %v2024_v41  ;;  %v2813_v39 = vadd.s32 %v2037_v44, %v919_v20  ;;  %v1245_v20 = vsel %vm3262_vm15, %v2493_v2, 0.0 }
 0x159   : > { %vm1051_vm15 = vcmp.lt.s32.totalorder %v2831_v38, 1024 }
 0x15a   : > { %v1304_v21 = vadd.f32 %v1303_v33, %v1241_v27  ;;  %v1243_v33 = vsel %vm3258_vm13, %v2403_v0, 0.0  ;;  %v2821_v52 = vadd.s32 %v2037_v44, %v920_v9  ;;  %vm3264_vm13 = vcmp.lt.s32.totalorder %v2813_v39, 1024 }
 0x15b   : > { %v1246_v9 = vsel %vm3263_vm0, %v2529_v36, 0.0  ;;  %vm1052_vm0 = vcmp.lt.s32.totalorder %v2839_v31, 1024 }
 0x15c   : > { %v1305_v37 = vadd.f32 %v1304_v21, %v1242_v29  ;;  %v1244_v21 = vsel %vm3260_vm14, %v2439_v17, 0.0  ;;  %vm3265_vm14 = vcmp.lt.s32.totalorder %v2821_v52, 1024 }
 0x15e   : > { %v1306_v27 = vadd.f32 %v1305_v37, %v1243_v33  ;;  %v923_v33 = vadd.s32 496, %v2024_v41 }
 0x160   : > { %v1307_v29 = vadd.f32 %v1306_v27, %v1244_v21  ;;  %v924_v21 = vadd.s32 504, %v2024_v41  ;;  %v2845_v32 = vadd.s32 %v2037_v44, %v923_v33 }
 0x162   : > { %v1308_v37 = vadd.f32 %v1307_v29, %v1245_v20  ;;  %v1247_v29 = vsel %vm3264_vm13, %v2475_v15, 0.0  ;;  %v2852_v14 = vadd.s32 %v2037_v44, %v924_v21  ;;  %vm1053_vm13 = vcmp.lt.s32.totalorder %v2845_v32, 1024 }
 0x163   : > { %v1251_v44 = vsel %vm1053_vm13, %v2547_v25, 0.0 }
 0x164   : > { %v1309_v27 = vadd.f32 %v1308_v37, %v1246_v9  ;;  %v1248_v37 = vsel %vm3265_vm14, %v2511_v5, 0.0  ;;  %v1249_v9 = vsel %vm1051_vm15, %v2565_v63, 0.0  ;;  %vm1054_vm14 = vcmp.lt.s32.totalorder %v2852_v14, 1024 }
 0x166   : > { %v1310_v20 = vadd.f32 %v1309_v27, %v1247_v29  ;;  %v1250_v27 = vsel %vm1052_vm0, %v2601_v7, 0.0 }
 0x168   : > { %v1311_v41 = vadd.f32 %v1310_v20, %v1248_v37  ;;  %v1252_v20 = vsel %vm1054_vm14, %v2583_v62, 0.0 }
 0x16a   : > { %v1312_v33 = vadd.f32 %v1311_v41, %v1249_v9 }
 0x16c   : > { %v1313_v29 = vadd.f32 %v1312_v33, %v1250_v27 }
 0x16e   : > { %v1314_v21 = vadd.f32 %v1313_v29, %v1251_v44 }
 0x170   : > { %v1315_v37 = vadd.f32 %v1314_v21, %v1252_v20 }
 0x172   : > { %v1316_v38 = vrot.slane %v1315_v37, 4 }
 0x174   : > { %v1317_v41 = vadd.f32 %v1316_v38, %v1315_v37  ;;  %v1322_v38 = vstv %s1060_s22 }
 0x175   : > { %1919 = vrcp.f32 %v1322_v38 }
 0x176   : > { %v1318_v9 = vrot.slane %v1317_v41, 2 }
 0x178   : > { %v1319_v31 = vadd.f32 %v1318_v9, %v1317_v41 }
 0x17a   : > { %v1320_v33 = vrot.slane %v1319_v31, 1 }
 0x17c   : > { %v1321_v27 = vadd.f32 %v1320_v33, %v1319_v31 }
 0x17e   : > { %1586 = vst [vmem:[%s2876_s20] sm:$0x1] %v1321_v27 }
 0x182   : > { %v1920_v29 = vpop.eup %1919 }
 0x183   : > { %v2879_v44 = vmul.f32 %v1920_v29, %v1321_v27 }
 0x185   : > { %v1325_v21 = vsub.f32 %v2060_v51, %v2879_v44  ;;  %v1326_v20 = vsub.f32 %v2088_v58, %v2879_v44  ;;  %v1327_v31 = vsub.f32 %v2039_v45, %v2879_v44  ;;  %v1328_v9 = vsub.f32 %v2072_v54, %v2879_v44 }
 0x186   : > { %v1329_v51 = vsub.f32 %v2129_v8, %v2879_v44  ;;  %v1330_v45 = vsub.f32 %v2163_v19, %v2879_v44  ;;  %v1331_v29 = vsub.f32 %v2109_v1, %v2879_v44  ;;  %v1332_v50 = vsub.f32 %v2144_v13, %v2879_v44 }
 0x187   : > { %v1389_v37 = vsel %vm991_vm1, %v1325_v21, 0.0  ;;  %v1390_v41 = vsel %vm992_vm2, %v1326_v20, 0.0  ;;  %v1391_v58 = vsel %vm993_vm3, %v1327_v31, 0.0  ;;  %v1392_v46 = vsel %vm994_vm4, %v1328_v9, 0.0 }
 0x188   : > { %v1453_v33 = vmul.f32 %v1389_v37, %v1389_v37  ;;  %v1454_v27 = vmul.f32 %v1390_v41, %v1390_v41  ;;  %v1455_v38 = vmul.f32 %v1391_v58, %v1391_v58  ;;  %v1393_v54 = vsel %vm995_vm5, %v1329_v51, 0.0 }
 0x189   : > { %v1456_v21 = vmul.f32 %v1392_v46, %v1392_v46  ;;  %v1394_v8 = vsel %vm996_vm6, %v1330_v45, 0.0  ;;  %v1457_v19 = vmul.f32 %v1393_v54, %v1393_v54  ;;  %v1333_v37 = vsub.f32 %v3343_v55, %v2879_v44 }
 0x18a   : > { %v1517_v48 = vadd.f32 %v1454_v27, %v1453_v33  ;;  %v1395_v9 = vsel %vm997_vm7, %v1331_v29, 0.0  ;;  %v1458_v1 = vmul.f32 %v1394_v8, %v1394_v8  ;;  %v1334_v27 = vsub.f32 %v3345_v60, %v2879_v44  ;;  %v3349_v29 = vld [vmem:[#allocation9_spill] sm:$0xff] }
 0x18b   : > { %v1396_v58 = vsel %vm998_vm8, %v1332_v50, 0.0  ;;  %v1459_v13 = vmul.f32 %v1395_v9, %v1395_v9  ;;  %v1335_v45 = vsub.f32 %v3347_v3, %v2879_v44  ;;  %v3351_v50 = vld [vmem:[#allocation16_spill] sm:$0xff] }
 0x18c   : > { %v1518_v20 = vadd.f32 %v1517_v48, %v1455_v38  ;;  %v1397_v48 = vsel %vm999_vm9, %v1333_v37, 0.0  ;;  %v1460_v54 = vmul.f32 %v1396_v58, %v1396_v58  ;;  %v1337_v41 = vsub.f32 %v3351_v50, %v2879_v44  ;;  %v3353_v37 = vld [vmem:[#allocation19_spill] sm:$0xff] }
 0x18d   : > { %v1338_v51 = vsub.f32 %v3353_v37, %v2879_v44 }
 0x18e   : > { %v1519_v31 = vadd.f32 %v1518_v20, %v1456_v21  ;;  %v1336_v20 = vsub.f32 %v3349_v29, %v2879_v44 }
 0x190   : > { %v1520_v33 = vadd.f32 %v1519_v31, %v1457_v19  ;;  %v1398_v19 = vsel %vm1000_vm10, %v1334_v27, 0.0  ;;  %v1461_v31 = vmul.f32 %v1397_v48, %v1397_v48  ;;  %v3355_v27 = vld [vmem:[#allocation13_spill] sm:$0xff]  ;;  %v3356_v48 = vld [vmem:[#allocation12_spill] sm:$0xff] }
 0x191   : > { %v1339_v38 = vsub.f32 %v3355_v27, %v2879_v44  ;;  %vm3357_vm1 = vcmp.lt.s32.totalorder %v3356_v48, 1024 }
 0x192   : > { %v1521_v46 = vadd.f32 %v1520_v33, %v1458_v1  ;;  %v1399_v1 = vsel %vm1001_vm11, %v1335_v45, 0.0  ;;  %v1462_v33 = vmul.f32 %v1398_v19, %v1398_v19  ;;  %v3358_v45 = vld [vmem:[#allocation17_spill] sm:$0xff]  ;;  %v3359_v19 = vld [vmem:[#allocation14_spill] sm:$0xff] }
 0x193   : > { %v1340_v8 = vsub.f32 %v3358_v45, %v2879_v44  ;;  %vm3360_vm2 = vcmp.lt.s32.totalorder %v3359_v19, 1024 }
 0x194   : > { %v1522_v21 = vadd.f32 %v1521_v46, %v1459_v13  ;;  %v1400_v13 = vsel %vm1002_vm12, %v1336_v20, 0.0  ;;  %v1463_v46 = vmul.f32 %v1399_v1, %v1399_v1  ;;  %v3361_v20 = vld [vmem:[#allocation24_spill] sm:$0xff]  ;;  %v3362_v1 = vld [vmem:[#allocation15_spill] sm:$0xff] }
 0x195   : > { %v1341_v9 = vsub.f32 %v3361_v20, %v2879_v44  ;;  %vm3363_vm3 = vcmp.lt.s32.totalorder %v3362_v1, 1024 }
 0x196   : > { %v1523_v55 = vadd.f32 %v1522_v21, %v1460_v54  ;;  %v1401_v54 = vsel %vm3357_vm1, %v1337_v41, 0.0  ;;  %v1464_v21 = vmul.f32 %v1400_v13, %v1400_v13  ;;  %v3364_v41 = vld [vmem:[#allocation27_spill] sm:$0xff]  ;;  %v3365_v13 = vld [vmem:[#allocation18_spill] sm:$0xff] }
 0x197   : > { %v1342_v58 = vsub.f32 %v3364_v41, %v2879_v44  ;;  %vm3366_vm4 = vcmp.lt.s32.totalorder %v3365_v13, 1024 }
 0x198   : > { %v1524_v60 = vadd.f32 %v1523_v55, %v1461_v31  ;;  %v1402_v31 = vsel %vm3360_vm2, %v1338_v51, 0.0  ;;  %v1465_v55 = vmul.f32 %v1401_v54, %v1401_v54  ;;  %v3367_v51 = vld [vmem:[#allocation21_spill] sm:$0xff]  ;;  %v3368_v54 = vld [vmem:[#allocation20_spill] sm:$0xff] }
 0x199   : > { %v1343_v48 = vsub.f32 %v3367_v51, %v2879_v44  ;;  %vm3369_vm5 = vcmp.lt.s32.totalorder %v3368_v54, 1024 }
 0x19a   : > { %v1525_v3 = vadd.f32 %v1524_v60, %v1462_v33  ;;  %v1403_v33 = vsel %vm3363_vm3, %v1339_v38, 0.0  ;;  %v1466_v60 = vmul.f32 %v1402_v31, %v1402_v31  ;;  %v3370_v38 = vld [vmem:[#allocation25_spill] sm:$0xff]  ;;  %v3371_v31 = vld [vmem:[#allocation22_spill] sm:$0xff] }
 0x19b   : > { %v1344_v19 = vsub.f32 %v3370_v38, %v2879_v44  ;;  %vm3372_vm6 = vcmp.lt.s32.totalorder %v3371_v31, 1024 }
 0x19c   : > { %v1526_v29 = vadd.f32 %v1525_v3, %v1463_v46  ;;  %v1404_v46 = vsel %vm3366_vm4, %v1340_v8, 0.0  ;;  %v1467_v3 = vmul.f32 %v1403_v33, %v1403_v33  ;;  %v3373_v8 = vld [vmem:[#allocation32_spill] sm:$0xff]  ;;  %v3374_v33 = vld [vmem:[#allocation23_spill] sm:$0xff] }
 0x19d   : > { %v1345_v1 = vsub.f32 %v3373_v8, %v2879_v44  ;;  %vm3375_vm7 = vcmp.lt.s32.totalorder %v3374_v33, 1024 }
 0x19e   : > { %v1527_v50 = vadd.f32 %v1526_v29, %v1464_v21  ;;  %v1405_v21 = vsel %vm3369_vm5, %v1341_v9, 0.0  ;;  %v1468_v29 = vmul.f32 %v1404_v46, %v1404_v46  ;;  %v3376_v9 = vld [vmem:[#allocation35_spill] sm:$0xff]  ;;  %v3377_v46 = vld [vmem:[#allocation26_spill] sm:$0xff] }
 0x19f   : > { %v1346_v13 = vsub.f32 %v3376_v9, %v2879_v44  ;;  %vm3378_vm8 = vcmp.lt.s32.totalorder %v3377_v46, 1024 }
 0x1a0   : > { %v1528_v37 = vadd.f32 %v1527_v50, %v1465_v55  ;;  %v1406_v55 = vsel %vm3372_vm6, %v1342_v58, 0.0  ;;  %v1469_v50 = vmul.f32 %v1405_v21, %v1405_v21  ;;  %v3379_v58 = vld [vmem:[#allocation29_spill] sm:$0xff]  ;;  %v3380_v21 = vld [vmem:[#allocation28_spill] sm:$0xff] }
 0x1a1   : > { %v1347_v54 = vsub.f32 %v3379_v58, %v2879_v44  ;;  %vm3381_vm9 = vcmp.lt.s32.totalorder %v3380_v21, 1024 }
 0x1a2   : > { %v1529_v27 = vadd.f32 %v1528_v37, %v1466_v60  ;;  %v1407_v60 = vsel %vm3375_vm7, %v1343_v48, 0.0  ;;  %v1470_v37 = vmul.f32 %v1406_v55, %v1406_v55  ;;  %v3382_v48 = vld [vmem:[#allocation33_spill] sm:$0xff]  ;;  %v3383_v55 = vld [vmem:[#allocation30_spill] sm:$0xff] }
 0x1a3   : > { %v1348_v31 = vsub.f32 %v3382_v48, %v2879_v44  ;;  %vm3384_vm10 = vcmp.lt.s32.totalorder %v3383_v55, 1024 }
 0x1a4   : > { %v1530_v45 = vadd.f32 %v1529_v27, %v1467_v3  ;;  %v1408_v3 = vsel %vm3378_vm8, %v1344_v19, 0.0  ;;  %v1471_v27 = vmul.f32 %v1407_v60, %v1407_v60  ;;  %v3385_v19 = vld [vmem:[#allocation40_spill] sm:$0xff]  ;;  %v3386_v60 = vld [vmem:[#allocation31_spill] sm:$0xff] }
 0x1a5   : > { %v1349_v33 = vsub.f32 %v3385_v19, %v2879_v44  ;;  %vm3387_vm11 = vcmp.lt.s32.totalorder %v3386_v60, 1024 }
 0x1a6   : > { %v1531_v20 = vadd.f32 %v1530_v45, %v1468_v29  ;;  %v1409_v29 = vsel %vm3381_vm9, %v1345_v1, 0.0  ;;  %v1472_v45 = vmul.f32 %v1408_v3, %v1408_v3  ;;  %v3388_v1 = vld [vmem:[#allocation43_spill] sm:$0xff]  ;;  %v3389_v3 = vld [vmem:[#allocation34_spill] sm:$0xff] }
 0x1a7   : > { %v1350_v46 = vsub.f32 %v3388_v1, %v2879_v44  ;;  %vm3390_vm12 = vcmp.lt.s32.totalorder %v3389_v3, 1024 }
 0x1a8   : > { %v1532_v41 = vadd.f32 %v1531_v20, %v1469_v50  ;;  %v1410_v50 = vsel %vm3384_vm10, %v1346_v13, 0.0  ;;  %v1473_v20 = vmul.f32 %v1409_v29, %v1409_v29  ;;  %v3391_v13 = vld [vmem:[#allocation37_spill] sm:$0xff]  ;;  %v3392_v29 = vld [vmem:[#allocation36_spill] sm:$0xff] }
 0x1a9   : > { %v1351_v21 = vsub.f32 %v3391_v13, %v2879_v44  ;;  %vm3393_vm1 = vcmp.lt.s32.totalorder %v3392_v29, 1024  ;;  %v3403_v29 = vld [vmem:[#allocation44_spill] sm:$0xff] }
 0x1aa   : > { %v1533_v51 = vadd.f32 %v1532_v41, %v1470_v37  ;;  %v1411_v37 = vsel %vm3387_vm11, %v1347_v54, 0.0  ;;  %v1474_v41 = vmul.f32 %v1410_v50, %v1410_v50  ;;  %v3394_v54 = vld [vmem:[#allocation41_spill] sm:$0xff]  ;;  %v3395_v50 = vld [vmem:[#allocation38_spill] sm:$0xff]  ;;  %vm3404_vm5 = vcmp.lt.s32.totalorder %v3403_v29, 1024 }
 0x1ab   : > { %v1352_v55 = vsub.f32 %v3394_v54, %v2879_v44  ;;  %vm3396_vm2 = vcmp.lt.s32.totalorder %v3395_v50, 1024  ;;  %v3405_v54 = vld [vmem:[#allocation45_spill] sm:$0xff] }
 0x1ac   : > { %v1534_v38 = vadd.f32 %v1533_v51, %v1471_v27  ;;  %v1412_v27 = vsel %vm3390_vm12, %v1348_v31, 0.0  ;;  %v1475_v51 = vmul.f32 %v1411_v37, %v1411_v37  ;;  %v3397_v31 = vld [vmem:[#allocation47_spill] sm:$0xff]  ;;  %vm3406_vm6 = vcmp.lt.s32.totalorder %v3405_v54, 1024 }
 0x1ad   : > { %v1353_v60 = vsub.f32 %v3397_v31, %v2879_v44  ;;  %v3398_v37 = vld [vmem:[#allocation39_spill] sm:$0xff]  ;;  %v1362_v54 = vsub.f32 %v2169_v22, %v2879_v44 }
 0x1ae   : > { %v1535_v8 = vadd.f32 %v1534_v38, %v1472_v45  ;;  %v1413_v45 = vsel %vm3393_vm1, %v1349_v33, 0.0  ;;  %v1476_v38 = vmul.f32 %v1412_v27, %v1412_v27  ;;  %vm3399_vm3 = vcmp.lt.s32.totalorder %v3398_v37, 1024  ;;  %v3400_v33 = vld [vmem:[#allocation50_spill] sm:$0xff] }
 0x1af   : > { %v1354_v3 = vsub.f32 %v3400_v33, %v2879_v44  ;;  %v3401_v27 = vld [vmem:[#allocation42_spill] sm:$0xff]  ;;  %v1359_v33 = vsub.f32 %v2049_v49, %v2879_v44 }
 0x1b0   : > { %v1536_v9 = vadd.f32 %v1535_v8, %v1473_v20  ;;  %v1414_v20 = vsel %vm3396_vm2, %v1350_v46, 0.0  ;;  %v1477_v8 = vmul.f32 %v1413_v45, %v1413_v45  ;;  %vm3402_vm4 = vcmp.lt.s32.totalorder %v3401_v27, 1024 }
 0x1b1   : > { %v1355_v46 = vsub.f32 %v2541_v56, %v2879_v44  ;;  %v1417_v45 = vsel %vm3404_vm5, %v1353_v60, 0.0  ;;  %v1418_v50 = vsel %vm3406_vm6, %v1354_v3, 0.0  ;;  %v1358_v60 = vsub.f32 %v2094_v61, %v2879_v44  ;;  %v3411_v3 = vld [vmem:[#allocation49_spill] sm:$0xff] }
 0x1b2   : > { %v1537_v58 = vadd.f32 %v1536_v9, %v1474_v41  ;;  %v1415_v41 = vsel %vm3399_vm3, %v1351_v21, 0.0  ;;  %v1478_v9 = vmul.f32 %v1414_v20, %v1414_v20  ;;  %v1356_v21 = vsub.f32 %v2576_v12, %v2879_v44 }
 0x1b3   : > { %v1481_v20 = vmul.f32 %v1417_v45, %v1417_v45  ;;  %v1482_v56 = vmul.f32 %v1418_v50, %v1418_v50  ;;  %vm3412_vm9 = vcmp.lt.s32.totalorder %v3411_v3, 1024  ;;  %v1361_v45 = vsub.f32 %v2133_v10, %v2879_v44  ;;  %v3417_v50 = vld [vmem:[#allocation53_spill] sm:$0xff] }
 0x1b4   : > { %v1538_v48 = vadd.f32 %v1537_v58, %v1475_v51  ;;  %v1416_v51 = vsel %vm3402_vm4, %v1352_v55, 0.0  ;;  %v1479_v58 = vmul.f32 %v1415_v41, %v1415_v41  ;;  %v1357_v55 = vsub.f32 %v2063_v53, %v2879_v44  ;;  %v3409_v41 = vld [vmem:[#allocation48_spill] sm:$0xff] }
 0x1b5   : > { %vm3410_vm8 = vcmp.lt.s32.totalorder %v3409_v41, 1024  ;;  %vm3418_vm12 = vcmp.lt.s32.totalorder %v3417_v50, 1024 }
 0x1b6   : > { %v1539_v19 = vadd.f32 %v1538_v48, %v1476_v38  ;;  %v1480_v38 = vmul.f32 %v1416_v51, %v1416_v51  ;;  %v1421_v27 = vsel %vm3412_vm9, %v1357_v55, 0.0  ;;  %v1363_v55 = vsub.f32 %v2115_v4, %v2879_v44 }
 0x1b7   : > { %v1485_v61 = vmul.f32 %v1421_v27, %v1421_v27  ;;  %v1366_v27 = vsub.f32 %v2241_v59, %v2879_v44 }
 0x1b8   : > { %v1540_v1 = vadd.f32 %v1539_v19, %v1477_v8  ;;  %v3407_v19 = vld [vmem:[#allocation46_spill] sm:$0xff] }
 0x1b9   : > { %vm3408_vm7 = vcmp.lt.s32.totalorder %v3407_v19, 1024  ;;  %v3419_v19 = vld [vmem:[#allocation54_spill] sm:$0xff] }
 0x1ba   : > { %v1541_v13 = vadd.f32 %v1540_v1, %v1478_v9  ;;  %v1419_v31 = vsel %vm3408_vm7, %v1355_v46, 0.0  ;;  %v1420_v9 = vsel %vm3410_vm8, %v1356_v21, 0.0  ;;  %vm3420_vm1 = vcmp.lt.s32.totalorder %v3419_v19, 1024 }
 0x1bb   : > { %v1483_v12 = vmul.f32 %v1419_v31, %v1419_v31  ;;  %v1484_v53 = vmul.f32 %v1420_v9, %v1420_v9  ;;  %v1425_v31 = vsel %vm3420_vm1, %v1361_v45, 0.0  ;;  %v1368_v45 = vsub.f32 %v2223_v40, %v2879_v44 }
 0x1bc   : > { %v1542_v48 = vadd.f32 %v1541_v13, %v1479_v58  ;;  %v1360_v58 = vsub.f32 %v2079_v57, %v2879_v44  ;;  %v3413_v13 = vld [vmem:[#allocation51_spill] sm:$0xff]  ;;  %v1489_v22 = vmul.f32 %v1425_v31, %v1425_v31  ;;  %v1371_v31 = vsub.f32 %v2259_v6, %v2879_v44 }
 0x1bd   : > { %vm3414_vm10 = vcmp.lt.s32.totalorder %v3413_v13, 1024  ;;  %v1367_v13 = vsub.f32 %v2187_v28, %v2879_v44 }
 0x1be   : > { %v1543_v8 = vadd.f32 %v1542_v48, %v1480_v38  ;;  %v1422_v46 = vsel %vm3414_vm10, %v1358_v60, 0.0  ;;  %v3415_v38 = vld [vmem:[#allocation52_spill] sm:$0xff]  ;;  %v3421_v60 = vld [vmem:[#allocation55_spill] sm:$0xff] }
 0x1bf   : > { %vm3416_vm11 = vcmp.lt.s32.totalorder %v3415_v38, 1024  ;;  %v1486_v49 = vmul.f32 %v1422_v46, %v1422_v46  ;;  %vm3422_vm2 = vcmp.lt.s32.totalorder %v3421_v60, 1024  ;;  %v3427_v46 = vld [vmem:[#allocation58_spill] sm:$0xff]  ;;  %v3429_v38 = vld [vmem:[#allocation59_spill] sm:$0xff]  ;;  %v1372_v60 = vsub.f32 %v2295_v30, %v2879_v44 }
 0x1c0   : > { %v1544_v37 = vadd.f32 %v1543_v8, %v1481_v20  ;;  %v1423_v48 = vsel %vm3416_vm11, %v1359_v33, 0.0  ;;  %v1424_v20 = vsel %vm3418_vm12, %v1360_v58, 0.0  ;;  %v1426_v41 = vsel %vm3422_vm2, %v1362_v54, 0.0  ;;  %v3431_v54 = vld [vmem:[#allocation60_spill] sm:$0xff] }
 0x1c1   : > { %v1487_v57 = vmul.f32 %v1423_v48, %v1423_v48  ;;  %v1488_v10 = vmul.f32 %v1424_v20, %v1424_v20  ;;  %v1490_v4 = vmul.f32 %v1426_v41, %v1426_v41  ;;  %vm3428_vm5 = vcmp.lt.s32.totalorder %v3427_v46, 1024  ;;  %v3437_v41 = vld [vmem:[#allocation63_spill] sm:$0xff] }
 0x1c2   : > { %v1545_v1 = vadd.f32 %v1544_v37, %v1482_v56  ;;  %v1364_v37 = vsub.f32 %v2151_v16, %v2879_v44  ;;  %vm3430_vm6 = vcmp.lt.s32.totalorder %v3429_v38, 1024  ;;  %vm3432_vm7 = vcmp.lt.s32.totalorder %v3431_v54, 1024  ;;  %v3449_v54 = vld [vmem:[#allocation69_spill] sm:$0xff] }
 0x1c3   : > { %v1430_v48 = vsel %vm3430_vm6, %v1366_v27, 0.0  ;;  %v1431_v50 = vsel %vm3432_vm7, %v1367_v13, 0.0  ;;  %vm3438_vm10 = vcmp.lt.s32.totalorder %v3437_v41, 1024  ;;  %v3441_v27 = vld [vmem:[#allocation65_spill] sm:$0xff]  ;;  %v1377_v38 = vsub.f32 %v2421_v23, %v2879_v44 }
 0x1c4   : > { %v1546_v51 = vadd.f32 %v1545_v1, %v1483_v12  ;;  %v1365_v12 = vsub.f32 %v2205_v34, %v2879_v44  ;;  %v3423_v1 = vld [vmem:[#allocation56_spill] sm:$0xff]  ;;  %v1494_v28 = vmul.f32 %v1430_v48, %v1430_v48  ;;  %v1495_v40 = vmul.f32 %v1431_v50, %v1431_v50 }
 0x1c5   : > { %vm3424_vm3 = vcmp.lt.s32.totalorder %v3423_v1, 1024  ;;  %v3439_v1 = vld [vmem:[#allocation64_spill] sm:$0xff]  ;;  %vm3442_vm12 = vcmp.lt.s32.totalorder %v3441_v27, 1024  ;;  %v1382_v41 = vsub.f32 %v2529_v36, %v2879_v44 }
 0x1c6   : > { %v1547_v29 = vadd.f32 %v1546_v51, %v1484_v53  ;;  %v1427_v33 = vsel %vm3424_vm3, %v1363_v55, 0.0  ;;  %v3425_v53 = vld [vmem:[#allocation57_spill] sm:$0xff]  ;;  %vm3440_vm11 = vcmp.lt.s32.totalorder %v3439_v1, 1024  ;;  %v3447_v48 = vld [vmem:[#allocation68_spill] sm:$0xff]  ;;  %v3459_v1 = vld [vmem:[#allocation74_spill] sm:$0xff] }
 0x1c7   : > { %vm3426_vm4 = vcmp.lt.s32.totalorder %v3425_v53, 1024  ;;  %v1491_v16 = vmul.f32 %v1427_v33, %v1427_v33  ;;  %v1435_v33 = vsel %vm3440_vm11, %v1371_v31, 0.0  ;;  %v1436_v53 = vsel %vm3442_vm12, %v1372_v60, 0.0 }
 0x1c8   : > { %v1548_v21 = vadd.f32 %v1547_v29, %v1485_v61  ;;  %v1428_v51 = vsel %vm3426_vm4, %v1364_v37, 0.0  ;;  %v1429_v61 = vsel %vm3428_vm5, %v1365_v12, 0.0  ;;  %v1373_v12 = vsub.f32 %v2349_v35, %v2879_v44 }
 0x1c9   : > { %v1492_v34 = vmul.f32 %v1428_v51, %v1428_v51  ;;  %v1493_v59 = vmul.f32 %v1429_v61, %v1429_v61  ;;  %v1499_v30 = vmul.f32 %v1435_v33, %v1435_v33  ;;  %v1500_v35 = vmul.f32 %v1436_v53, %v1436_v53 }
 0x1ca   : > { %v1549_v8 = vadd.f32 %v1548_v21, %v1486_v49  ;;  %v1369_v21 = vsub.f32 %v2277_v18, %v2879_v44  ;;  %v1376_v61 = vsub.f32 %v2367_v26, %v2879_v44  ;;  %vm3448_vm3 = vcmp.lt.s32.totalorder %v3447_v48, 1024 }
 0x1cb   : > { %vm3450_vm4 = vcmp.lt.s32.totalorder %v3449_v54, 1024  ;;  %v1385_v53 = vsub.f32 %v2565_v63, %v2879_v44  ;;  %vm3462_vm11 = vcmp.lt.s32.totalorder %v2813_v39, 1024  ;;  %vm3463_vm12 = vcmp.lt.s32.totalorder %v2821_v52, 1024 }
 0x1cc   : > { %v1550_v56 = vadd.f32 %v1549_v8, %v1487_v57  ;;  %v1370_v57 = vsub.f32 %v2313_v43, %v2879_v44  ;;  %v3433_v8 = vld [vmem:[#allocation61_spill] sm:$0xff]  ;;  %v1440_v50 = vsel %vm3450_vm4, %v1376_v61, 0.0  ;;  %v1388_v39 = vsub.f32 %v2583_v62, %v2879_v44 }
 0x1cd   : > { %vm3434_vm8 = vcmp.lt.s32.totalorder %v3433_v8, 1024  ;;  %v1504_v23 = vmul.f32 %v1440_v50, %v1440_v50 }
 0x1ce   : > { %v1551_v9 = vadd.f32 %v1550_v56, %v1488_v10  ;;  %v1432_v55 = vsel %vm3434_vm8, %v1368_v45, 0.0  ;;  %v3435_v10 = vld [vmem:[#allocation62_spill] sm:$0xff] }
 0x1cf   : > { %vm3436_vm9 = vcmp.lt.s32.totalorder %v3435_v10, 1024  ;;  %v1496_v18 = vmul.f32 %v1432_v55, %v1432_v55 }
 0x1d0   : > { %v1552_v3 = vadd.f32 %v1551_v9, %v1489_v22  ;;  %v1433_v56 = vsel %vm3436_vm9, %v1369_v21, 0.0  ;;  %v1434_v22 = vsel %vm3438_vm10, %v1370_v57, 0.0  ;;  %v1378_v21 = vsub.f32 %v2457_v24, %v2879_v44  ;;  %v3451_v57 = vld [vmem:[#allocation70_spill] sm:$0xff] }
 0x1d1   : > { %v1497_v43 = vmul.f32 %v1433_v56, %v1433_v56  ;;  %v1498_v6 = vmul.f32 %v1434_v22, %v1434_v22  ;;  %vm3452_vm5 = vcmp.lt.s32.totalorder %v3451_v57, 1024  ;;  %v1381_v56 = vsub.f32 %v2493_v2, %v2879_v44  ;;  %v3457_v22 = vld [vmem:[#allocation73_spill] sm:$0xff] }
 0x1d2   : > { %v1553_v58 = vadd.f32 %v1552_v3, %v1490_v4  ;;  %v1374_v3 = vsub.f32 %v2385_v42, %v2879_v44  ;;  %v1441_v8 = vsel %vm3452_vm5, %v1377_v38, 0.0  ;;  %vm3458_vm8 = vcmp.lt.s32.totalorder %v3457_v22, 1024 }
 0x1d3   : > { %v1505_v24 = vmul.f32 %v1441_v8, %v1441_v8  ;;  %vm3460_vm9 = vcmp.lt.s32.totalorder %v3459_v1, 1024  ;;  %vm3461_vm10 = vcmp.lt.s32.totalorder %v2807_v47, 1024  ;;  %v1387_v47 = vsub.f32 %v2547_v25, %v2879_v44 }
 0x1d4   : > { %v1554_v29 = vadd.f32 %v1553_v58, %v1491_v16  ;;  %v1375_v16 = vsub.f32 %v2331_v11, %v2879_v44  ;;  %v3443_v58 = vld [vmem:[#allocation66_spill] sm:$0xff]  ;;  %v1445_v33 = vsel %vm3460_vm9, %v1381_v56, 0.0  ;;  %v1452_v25 = vsel %vm1054_vm14, %v1388_v39, 0.0 }
 0x1d5   : > { %vm3444_vm1 = vcmp.lt.s32.totalorder %v3443_v58, 1024  ;;  %v1509_v36 = vmul.f32 %v1445_v33, %v1445_v33  ;;  %v1451_v52 = vsel %vm1053_vm13, %v1387_v47, 0.0 }
 0x1d6   : > { %v1555_v49 = vadd.f32 %v1554_v29, %v1492_v34  ;;  %v1437_v13 = vsel %vm3444_vm1, %v1373_v12, 0.0  ;;  %v3445_v34 = vld [vmem:[#allocation67_spill] sm:$0xff]  ;;  %v1383_v12 = vsub.f32 %v2475_v15, %v2879_v44  ;;  %v1515_v48 = vmul.f32 %v1451_v52, %v1451_v52 }
 0x1d7   : > { %vm3446_vm2 = vcmp.lt.s32.totalorder %v3445_v34, 1024  ;;  %v1501_v42 = vmul.f32 %v1437_v13, %v1437_v13 }
 0x1d8   : > { %v1556_v20 = vadd.f32 %v1555_v49, %v1493_v59  ;;  %v1438_v29 = vsel %vm3446_vm2, %v1374_v3, 0.0  ;;  %v1439_v59 = vsel %vm3448_vm3, %v1375_v16, 0.0  ;;  %v1446_v3 = vsel %vm3461_vm10, %v1382_v41, 0.0 }
 0x1d9   : > { %v1502_v11 = vmul.f32 %v1438_v29, %v1438_v29  ;;  %v1503_v26 = vmul.f32 %v1439_v59, %v1439_v59  ;;  %v1510_v15 = vmul.f32 %v1446_v3, %v1446_v3  ;;  %v1386_v16 = vsub.f32 %v2601_v7, %v2879_v44 }
 0x1da   : > { %v1557_v19 = vadd.f32 %v1556_v20, %v1494_v28  ;;  %v1379_v20 = vsub.f32 %v2403_v0, %v2879_v44 }
 0x1db   : > { %v1450_v29 = vsel %vm1052_vm0, %v1386_v16, 0.0 }
 0x1dc   : > { %v1558_v37 = vadd.f32 %v1557_v19, %v1495_v40  ;;  %v1380_v40 = vsub.f32 %v2439_v17, %v2879_v44  ;;  %v3453_v19 = vld [vmem:[#allocation71_spill] sm:$0xff] }
 0x1dd   : > { %vm3454_vm6 = vcmp.lt.s32.totalorder %v3453_v19, 1024 }
 0x1de   : > { %v1559_v9 = vadd.f32 %v1558_v37, %v1496_v18  ;;  %v1442_v31 = vsel %vm3454_vm6, %v1378_v21, 0.0  ;;  %v3455_v18 = vld [vmem:[#allocation72_spill] sm:$0xff] }
 0x1df   : > { %vm3456_vm7 = vcmp.lt.s32.totalorder %v3455_v18, 1024  ;;  %v1506_v0 = vmul.f32 %v1442_v31, %v1442_v31 }
 0x1e0   : > { %v1560_v4 = vadd.f32 %v1559_v9, %v1497_v43  ;;  %v1443_v37 = vsel %vm3456_vm7, %v1379_v20, 0.0  ;;  %v1444_v43 = vsel %vm3458_vm8, %v1380_v40, 0.0 }
 0x1e1   : > { %v1507_v17 = vmul.f32 %v1443_v37, %v1443_v37  ;;  %v1508_v2 = vmul.f32 %v1444_v43, %v1444_v43 }
 0x1e2   : > { %v1561_v51 = vadd.f32 %v1560_v4, %v1498_v6  ;;  %v1384_v4 = vsub.f32 %v2511_v5, %v2879_v44 }
 0x1e4   : > { %v1562_v46 = vadd.f32 %v1561_v51, %v1499_v30  ;;  %v1447_v30 = vsel %vm3462_vm11, %v1383_v12, 0.0  ;;  %v1448_v58 = vsel %vm3463_vm12, %v1384_v4, 0.0 }
 0x1e5   : > { %v1511_v5 = vmul.f32 %v1447_v30, %v1447_v30  ;;  %v1512_v63 = vmul.f32 %v1448_v58, %v1448_v58 }
 0x1e6   : > { %v1563_v45 = vadd.f32 %v1562_v46, %v1500_v35  ;;  %v1449_v46 = vsel %vm1051_vm15, %v1385_v53, 0.0 }
 0x1e7   : > { %v1513_v7 = vmul.f32 %v1449_v46, %v1449_v46 }
 0x1e8   : > { %v1564_v49 = vadd.f32 %v1563_v45, %v1501_v42  ;;  %v1514_v45 = vmul.f32 %v1450_v29, %v1450_v29 }
 0x1ea   : > { %v1565_v28 = vadd.f32 %v1564_v49, %v1502_v11  ;;  %v1516_v11 = vmul.f32 %v1452_v25, %v1452_v25 }
 0x1ec   : > { %v1566_v55 = vadd.f32 %v1565_v28, %v1503_v26 }
 0x1ee   : > { %v1567_v10 = vadd.f32 %v1566_v55, %v1504_v23 }
 0x1f0   : > { %v1568_v60 = vadd.f32 %v1567_v10, %v1505_v24 }
 0x1f2   : > { %v1569_v9 = vadd.f32 %v1568_v60, %v1506_v0 }
 0x1f4   : > { %v1570_v6 = vadd.f32 %v1569_v9, %v1507_v17 }
 0x1f6   : > { %v1571_v27 = vadd.f32 %v1570_v6, %v1508_v2 }
 0x1f8   : > { %v1572_v51 = vadd.f32 %v1571_v27, %v1509_v36 }
 0x1fa   : > { %v1573_v13 = vadd.f32 %v1572_v51, %v1510_v15 }
 0x1fc   : > { %v1574_v61 = vadd.f32 %v1573_v13, %v1511_v5 }
 0x1fe   : > { %v1575_v42 = vadd.f32 %v1574_v61, %v1512_v63 }
 0x200   : > { %v1576_v38 = vadd.f32 %v1575_v42, %v1513_v7 }
 0x202   : > { %v1577_v59 = vadd.f32 %v1576_v38, %v1514_v45 }
 0x204   : > { %v1578_v49 = vadd.f32 %v1577_v59, %v1515_v48 }
 0x206   : > { %v1579_v21 = vadd.f32 %v1578_v49, %v1516_v11 }
 0x208   : > { %v1580_v62 = vrot.slane %v1579_v21, 4 }
 0x20a   : > { %v1581_v44 = vadd.f32 %v1580_v62, %v1579_v21 }
 0x20c   : > { %v1582_v54 = vrot.slane %v1581_v44, 2 }
 0x20e   : > { %v1583_v50 = vadd.f32 %v1582_v54, %v1581_v44 }
 0x210   : > { %v1584_v26 = vrot.slane %v1583_v50, 1 }
 0x212   : > { %v1585_v28 = vadd.f32 %v1584_v26, %v1583_v50 }
 0x214   : > { %1587 = vst [vmem:[%s2876_s20 + $0x1] sm:$0x1] %v1585_v28 }
 0x215 PF: > { %s14_s12 = sadd.s32 1, %s1927_s12  }
 0x216   : > { %p11_p7 = scmp.ge.s32.totalorder %s14_s12, 4  }
 0x218   :  { %13 = sbr.rel (!%p11_p7) target bundleno = 1 (0x1), region = 70 }

</bundles_post_ra>
